<compile_context>
chip_gen: v6e
topology: v6e:2x2x1
jax: 0.10.0
libtpu: 0.0.40
codegen_flags: <defaults>
</compile_context>

<pallas_src>
import jax
import jax.numpy as jnp
from jax.experimental import pallas as pl
from jax.experimental.pallas import tpu as pltpu


def autoencoder_kernel(x_ref, wt_ref, w_ref, b_ref, o_ref):
    x = x_ref[...]            # (tb, D_in)
    wt = wt_ref[...]          # (D_in, D_hid)   -- pre-transposed encoder weight
    w = w_ref[...]            # (D_hid, D_in)   -- torch Linear.weight layout (decoder)
    b = b_ref[...]            # (1, D_hid)      -- f32

    # Encoder: x @ W^T in canonical (M,K)x(K,N) form -> MXU, f32 accumulate.
    h = jnp.dot(x, wt, preferred_element_type=jnp.float32)
    # Bias + ReLU fused, in f32 (v5e has no bf16 VPU).
    h = jnp.maximum(h + b, 0.0)

    # Decoder with tied weights: h @ W, also canonical.  Cast h to the weight dtype so
    # the bf16 path uses the native bf16 MXU; f32 path is a no-op cast.
    y = jnp.dot(h.astype(w.dtype), w, preferred_element_type=jnp.float32)

    # Exact sigmoid via a single EUP tanh pass + 2 cheap VALU ops.
    o_ref[...] = (0.5 * jnp.tanh(0.5 * y) + 0.5).astype(o_ref.dtype)


def autoencoder_forward(x, w, b, *, block_b=512, compute_dtype=None):
    """x: (B, D_in), w: (D_hid, D_in), b: (D_hid,) -> (B, D_in) in x.dtype."""
    B, D_in = x.shape
    D_hid = w.shape[0]

    cdt = compute_dtype if compute_dtype is not None else x.dtype
    x_in = x.astype(cdt)
    w_in = w.astype(cdt)
    wt_in = w_in.T                          # one-time XLA transpose (128 KiB), VMEM-resident
    b2d = b.reshape(1, D_hid).astype(jnp.float32)   # epilogue math stays f32

    # Batch tile: whole batch if small, otherwise block_b-row tiles (multiple of 8
    # sublanes).  No padding -- Pallas masks the ragged edge block.
    tb = B if B <= block_b else block_b
    grid = (pl.cdiv(B, tb),)

    return pl.pallas_call(
        autoencoder_kernel,
        out_shape=jax.ShapeDtypeStruct((B, D_in), x.dtype),
        grid_spec=pltpu.PrefetchScalarGridSpec(
            num_scalar_prefetch=0,
            grid=grid,
            in_specs=[
                # Activation tile marches over the batch (pipelined / double-buffered).
                pl.BlockSpec((tb, D_in), lambda i: (i, 0)),
                # Weights (both orientations) + bias: constant block index -> resident.
                pl.BlockSpec((D_in, D_hid), lambda i: (0, 0)),
                pl.BlockSpec((D_hid, D_in), lambda i: (0, 0)),
                pl.BlockSpec((1, D_hid), lambda i: (0, 0)),
            ],
            out_specs=pl.BlockSpec((tb, D_in), lambda i: (i, 0)),
        ),
        compiler_params=pltpu.CompilerParams(
            # Batch tiles are independent -> shard across TensorCores on v7x.
            dimension_semantics=("parallel",),
        ),
    )(x_in, wt_in, w_in, b2d)


if __name__ == "__main__":
    # Shapes consistent with the module: input_dim=256, hidden=128.
    # Batch 1024 with the default 512-row tile gives grid=(2,) "parallel": both
    # TensorCores busy on v7x, near-roofline 512-row tiles on single-TC v5e/v6e.
    B, D_IN, D_HID = 1024, 256, 128

    key = jax.random.PRNGKey(0)
    kx, kw, kb = jax.random.split(key, 3)

    x = jax.random.normal(kx, (B, D_IN), dtype=jnp.float32)
    # Deterministic init mimicking nn.Linear's uniform(-1/sqrt(fan_in), 1/sqrt(fan_in)).
    bound = 1.0 / (D_IN ** 0.5)
    w = jax.random.uniform(kw, (D_HID, D_IN), dtype=jnp.float32,
                           minval=-bound, maxval=bound)
    b = jax.random.uniform(kb, (D_HID,), dtype=jnp.float32,
                           minval=-bound, maxval=bound)

    # f32 end-to-end for a tight correctness check; pass compute_dtype=jnp.bfloat16 to
    # halve streamed HBM bytes / hit the native bf16 MXU on v6e/v7x (loosen tolerance).
    out = autoencoder_forward(x, w, b)
    out = jax.block_until_ready(out)

    # Reference in plain JAX (same math as the torch module).
    h_ref = jnp.maximum(x @ w.T + b, 0.0)
    ref = jax.nn.sigmoid(h_ref @ w)
    assert out.shape == (B, D_IN)
    assert jnp.allclose(out, ref, atol=1e-4, rtol=1e-4), float(jnp.max(jnp.abs(out - ref)))

    print("KERNEL_OK")
</pallas_src>

<mosaic_0001>
module attributes {stable_mosaic.version = 11 : i64} {
  func.func @autoencoder_kernel(%arg0: i32, %arg1: memref<512x256xf32, #tpu.memory_space<vmem>>, %arg2: memref<256x128xf32, #tpu.memory_space<vmem>>, %arg3: memref<128x256xf32, #tpu.memory_space<vmem>>, %arg4: memref<1x128xf32, #tpu.memory_space<vmem>>, %arg5: memref<512x256xf32, #tpu.memory_space<vmem>>) attributes {dimension_semantics = [#tpu.dimension_semantics<parallel>], iteration_bounds = array<i64: 2>, scalar_prefetch = 0 : i64, scratch_operands = 0 : i64, tpu.core_type = #tpu.core_type<tc>, window_params = [{transform_indices = @transform_0, window_bounds = array<i64: 512, 256>}, {pipeline_mode = #tpu.pipeline_mode<synchronous>, transform_indices = @transform_1, window_bounds = array<i64: 256, 128>}, {pipeline_mode = #tpu.pipeline_mode<synchronous>, transform_indices = @transform_2, window_bounds = array<i64: 128, 256>}, {pipeline_mode = #tpu.pipeline_mode<synchronous>, transform_indices = @transform_3, window_bounds = array<i64: 1, 128>}, {transform_indices = @transform_4, window_bounds = array<i64: 512, 256>}]} {
    %c0 = arith.constant 0 : index
    %c0_0 = arith.constant 0 : index
    %0 = vector.load %arg1[%c0, %c0_0] : memref<512x256xf32, #tpu.memory_space<vmem>>, vector<512x256xf32>
    %c0_1 = arith.constant 0 : index
    %c0_2 = arith.constant 0 : index
    %1 = vector.load %arg2[%c0_1, %c0_2] : memref<256x128xf32, #tpu.memory_space<vmem>>, vector<256x128xf32>
    %c0_3 = arith.constant 0 : index
    %c0_4 = arith.constant 0 : index
    %2 = vector.load %arg3[%c0_3, %c0_4] : memref<128x256xf32, #tpu.memory_space<vmem>>, vector<128x256xf32>
    %c0_5 = arith.constant 0 : index
    %c0_6 = arith.constant 0 : index
    %3 = vector.load %arg4[%c0_5, %c0_6] : memref<1x128xf32, #tpu.memory_space<vmem>>, vector<1x128xf32>
    %cst = arith.constant dense<0.000000e+00> : vector<512x128xf32>
    %4 = tpu.matmul %0, %1, %cst {dimension_numbers = #tpu.dot_dimension_numbers<[1], [0], [0], [1], [0, 0, 1, 1], [], []>} : vector<512x256xf32>, vector<256x128xf32>, vector<512x128xf32> -> vector<512x128xf32>
    %5 = vector.broadcast %3 : vector<1x128xf32> to vector<512x128xf32>
    %6 = arith.addf %4, %5 : vector<512x128xf32>
    %cst_7 = arith.constant 0.000000e+00 : f32
    %7 = vector.broadcast %cst_7 : f32 to vector<512x128xf32>
    %8 = arith.maximumf %6, %7 : vector<512x128xf32>
    %cst_8 = arith.constant dense<0.000000e+00> : vector<512x256xf32>
    %9 = tpu.matmul %8, %2, %cst_8 {dimension_numbers = #tpu.dot_dimension_numbers<[1], [0], [0], [1], [0, 0, 1, 1], [], []>} : vector<512x128xf32>, vector<128x256xf32>, vector<512x256xf32> -> vector<512x256xf32>
    %cst_9 = arith.constant 5.000000e-01 : f32
    %10 = vector.broadcast %cst_9 : f32 to vector<512x256xf32>
    %11 = arith.mulf %10, %9 : vector<512x256xf32>
    %12 = math.tanh %11 : vector<512x256xf32>
    %cst_10 = arith.constant 5.000000e-01 : f32
    %13 = vector.broadcast %cst_10 : f32 to vector<512x256xf32>
    %14 = arith.mulf %13, %12 : vector<512x256xf32>
    %cst_11 = arith.constant 5.000000e-01 : f32
    %15 = vector.broadcast %cst_11 : f32 to vector<512x256xf32>
    %16 = arith.addf %14, %15 : vector<512x256xf32>
    %c0_12 = arith.constant 0 : index
    %c0_13 = arith.constant 0 : index
    %17 = vector.load %arg5[%c0_12, %c0_13] : memref<512x256xf32, #tpu.memory_space<vmem>>, vector<512x256xf32>
    tpu.vector_store %arg5[%c0_12, %c0_13], %16 {strides = array<i32>} : memref<512x256xf32, #tpu.memory_space<vmem>>, vector<512x256xf32>,
    return
  }
  func.func @transform_0(%arg0: i32) -> (i32, i32) {
    %c0_i32 = arith.constant 0 : i32
    %c0_i32_0 = arith.constant 0 : i32
    return %arg0, %c0_i32 : i32, i32
  }
  func.func @transform_1(%arg0: i32) -> (i32, i32) {
    %c0_i32 = arith.constant 0 : i32
    %c0_i32_0 = arith.constant 0 : i32
    %c0_i32_1 = arith.constant 0 : i32
    return %c0_i32, %c0_i32_0 : i32, i32
  }
  func.func @transform_2(%arg0: i32) -> (i32, i32) {
    %c0_i32 = arith.constant 0 : i32
    %c0_i32_0 = arith.constant 0 : i32
    %c0_i32_1 = arith.constant 0 : i32
    return %c0_i32, %c0_i32_0 : i32, i32
  }
  func.func @transform_3(%arg0: i32) -> (i32, i32) {
    %c0_i32 = arith.constant 0 : i32
    %c0_i32_0 = arith.constant 0 : i32
    %c0_i32_1 = arith.constant 0 : i32
    return %c0_i32, %c0_i32_0 : i32, i32
  }
  func.func @transform_4(%arg0: i32) -> (i32, i32) {
    %c0_i32 = arith.constant 0 : i32
    %c0_i32_0 = arith.constant 0 : i32
    return %arg0, %c0_i32 : i32, i32
  }
}

</mosaic_0001>

<bundles_post_ra>
// kernel: tpu_custom_call.1
= control target key start
LH: loop header
LB: loop body
LE: loop exit
PB: predicated region body
PF: predicated region fallthrough
CT: control target
= control target key end

     0   :  { %9 = vsyncpa [#allocation3], 0  ;;  %s3263_s0 = inlined_call_operand.hbm [shape: f32[1024,256], index: 0, kind: input, shape index: {}]   ;;  %s3264_s1 = inlined_call_operand.hbm [shape: f32[256,128], index: 1, kind: input, shape index: {}]   ;;  %s3265_s2 = inlined_call_operand.hbm [shape: f32[128,256], index: 2, kind: input, shape index: {}]   ;;  %s3266_s3 = inlined_call_operand.vmem [shape: f32[1,128], index: 3, kind: input, shape index: {}]   ;;  %s3267_s4 = inlined_call_operand.hbm [shape: f32[1024,256], index: 4, kind: output, shape index: {}]  }
   0x1   :  { %11 = vsyncpa [#allocation3 + $0x1], 0 }
   0x2   :  { %12 = vsyncpa [#allocation6], 0 }
   0x3   :  { %13 = vsyncpa [#allocation4], 0 }
   0x4   :  { %15 = vsyncpa [#allocation4 + $0x1], 0  ;;  %s2634_s15 = smov 0   ;;  %s2636_s16 = smov 0  }
   0x5   :  { %s2638_s17 = smov 0   ;;  %s2640_s18 = smov 0  }
   0x6 LB: > { %s2655_s19 = sadd.s32 4294967295, %s2596_s18   ;;  %s2092_s20 = sadd.s32 4294967294, %s2596_s18   ;;  %s2596_s18 = sphi %s2640_s18, %s3289_s18   ;;  %s2592_s17 = sphi %s2638_s17, %s3288_s17   ;;  %s2588_s16 = sphi %s2636_s16, %s3287_s16   ;;  %s2584_s15 = sphi %s2634_s15, %s3286_s15  }
   0x7   : > { %p41_p0 = scmp.ne.s32.totalorder %s2588_s16, %s2584_s15  ;;  %p3268_p1 = scmp.eq.s32.totalorder %s2655_s19, 0 }
   0x8   : > { %p134_p3 = scmp.eq.s32.totalorder %s2092_s20, 1  ;;  %p2093_p5 = scmp.ge.s32.totalorder %s2596_s18, 1 }
   0x9   : > { %p2664_p4 = por %p3268_p1, %p41_p0  ;;  %p141_p7 = scmp.lt.s32.totalorder %s2596_s18, 3 }
   0xa   : > { %p2669_p6 = por %p134_p3, %p41_p0  ;;  %s2598_s24 = smov [#allocation5]  }
   0xb   : > { %s3272_s21 = scalar_select %p2664_p4, 1, 0 }
   0xc   : > { %s3273_s22 = scalar_select %p2669_p6, 1, 0 }
   0xd   : > { %p2674_p8 = pnand %p2093_p5, %p141_p7  ;;  %s153_s25 = sshll.u32 %s2598_s24, 4  ;;  %s154_s25 = int_to_ptr.vmem [resolvable:$true] %s153_s25 }
   0xe   : > { %s2599_s27 = smov [#allocation7]   ;;  %s2459_s29 = scalar_lea.vmem %s154_s25, 4096 }
   0xf   : > { %s3274_s23 = scalar_select %p2674_p8, 1, 0 }
  0x10   : > { %p2129_p9 = pneg %p2674_p8  ;;  %s166_s28 = sshll.u32 %s2599_s27, 4  ;;  %s167_s28 = int_to_ptr.vmem [resolvable:$true] %s166_s28 }
  0x11   : > { %p2460_p13 = scmp.ne.s32.totalorder %s154_s25, %s2459_s29  ;;  %p2467_p5 = scmp.lt.s32.totalorder %s154_s25, %s154_s25 }
  0x12   : > { %p2683_p11 = pnand %p2129_p9, %p3268_p1  ;;  %p2468_p7 = scmp.lt.s32.totalorder %s2459_s29, %s2459_s29 }
  0x14   : > { %p2450_p12 = pneg %p2683_p11  ;;  %p2469_p10 = por %p2468_p7, %p2467_p5 }
  0x16   : > { %p2462_p0 = pnand %p2460_p13, %p2450_p12 }
  0x18   : > { %p2463_p3 = pneg %p2462_p0 }
  0x1a   : > { %p2470_p9 = pnand %p2469_p10, %p2463_p3 }
  0x1c   : > { %2473 = shalt.err (!%p2470_p9)
}
  0x1d   : > { %s2600_s30 = smov 128   ;;  %s2601_s5 = smov 8  }
  0x1e   : > { %2132 = dma.hbm_to_vmem [thread:$0]  (!%p2683_p11), %s3264_s1, 4096, %s154_s25, [#allocation6], %s2600_s30, %s2600_s30, %s2601_s5  }
  0x1f   : > { %s2485_s8 = scalar_lea.vmem %s167_s28, 4096  ;;  %p2493_p2 = scmp.lt.s32.totalorder %s167_s28, %s167_s28 }
  0x20   : > { %p2486_p1 = scmp.ne.s32.totalorder %s167_s28, %s2485_s8  ;;  %p2494_p6 = scmp.lt.s32.totalorder %s2485_s8, %s2485_s8 }
  0x22   : > { %p2488_p13 = pnand %p2486_p1, %p2450_p12  ;;  %p2495_p5 = por %p2494_p6, %p2493_p2 }
  0x24   : > { %p2489_p0 = pneg %p2488_p13 }
  0x26   : > { %p2496_p10 = pnand %p2495_p5, %p2489_p0 }
  0x28   : > { %2499 = shalt.err (!%p2496_p10)
}
  0x29   : > { %s2602_s9 = smov 256   ;;  %s2603_s10 = smov 16  }
  0x2a   : > { %2135 = dma.hbm_to_vmem [thread:$0]  (!%p2683_p11), %s3265_s2, 4096, %s167_s28, [#allocation6], %s2602_s9, %s2602_s9, %s2603_s10  }
  0x2b   : > { %s2709_s13 = sadd.s32 1, %s2596_s18   ;;  %s28_s20 = sadd.s32 1, %s2592_s17 }
  0x2c   : > { %s25_s14 = ssub.s32 %s2596_s18, %s2709_s13  ;;  %p35_p2 = scmp.ne.s32.totalorder %s2592_s17, %s2588_s16 }
  0x2d   : > { %p26_p1 = scmp.eq.s32.totalorder %s25_s14, 0  ;;  %p36_p6 = scmp.eq.s32.totalorder %s2596_s18, 0 }
  0x2e   : > { %p3276_p3 = scmp.eq.s32.totalorder %s2655_s19, 1  ;;  %p2146_p9 = scmp.lt.s32.totalorder %s2596_s18, 2 }
  0x2f   : > { %s2718_s24 = scalar_select %p26_p1, %s2592_s17, %s28_s20  }
  0x30   : > { %p37_p12 = por %p36_p6, %p35_p2  ;;  %p2722_p7 = por %p3276_p3, %p35_p2 }
  0x31   : > { %s183_s26 = sand.u32 1, %s2592_s17   ;;  %s2114_s28 = sshll.u32 %s2596_s18, 14 }
  0x32   : > { %s3277_s25 = scalar_select %p2722_p7, 1, 0 }
  0x33   : > { %s2097_s27 = sshll.u32 %s183_s26, 10  ;;  %s2732_s5 = scalar_lea.hbm %s3263_s0, %s2114_s28 }
  0x34   : > { %s187_s6 = scalar_lea.vmem [#allocation2], %s2097_s27  ;;  %p2736_p11 = pnand %p2146_p9, %p37_p12 }
  0x35   : > { %s195_s7 = sshll.u32 %s187_s6, 4  ;;  %s2740_s11 = scalar_lea.sflag [#allocation3], %s183_s26  ;;  %s2734_s7 = int_to_ptr.vmem [resolvable:$true] %s195_s7 }
  0x36   : > { %s2500_s12 = scalar_lea.hbm %s2732_s5, 16384  ;;  %p2502_p0 = pneg %p2736_p11 }
  0x37   : > { %p2501_p13 = scmp.ne.s32.totalorder %s2732_s5, %s2500_s12  ;;  %s2505_s27 = scalar_lea.hbm %s3263_s0, 32768 }
  0x38   : > { %p2506_p1 = scmp.lt.s32.totalorder %s2732_s5, %s3263_s0  ;;  %p2507_p2 = scmp.lt.s32.totalorder %s2505_s27, %s2500_s12 }
  0x39   : > { %p2503_p5 = pnand %p2502_p0, %p2501_p13 }
  0x3a   : > { %p2508_p6 = por %p2507_p2, %p2506_p1 }
  0x3b   : > { %p2504_p10 = pneg %p2503_p5 }
  0x3d   : > { %p2509_p12 = pnand %p2508_p6, %p2504_p10 }
  0x3f   : > { %2512 = shalt.err (!%p2509_p12)
}
  0x40   : > { %s2513_s26 = scalar_lea.vmem %s2734_s7, 16384  ;;  %s2604_s30 = smov [#allocation2]  }
  0x41   : > { %p2514_p3 = scmp.ne.s32.totalorder %s2734_s7, %s2513_s26  ;;  %s2518_s6 = sshll.u32 %s2604_s30, 4  ;;  %s2519_s6 = int_to_ptr.vmem [resolvable:$false] %s2518_s6 }
  0x42   : > { %s2520_s14 = scalar_lea.vmem %s2519_s6, 32768  ;;  %p2521_p5 = scmp.lt.s32.totalorder %s2734_s7, %s2519_s6 }
  0x43   : > { %p2516_p9 = pnand %p2514_p3, %p2502_p0  ;;  %p2522_p7 = scmp.lt.s32.totalorder %s2520_s14, %s2513_s26 }
  0x45   : > { %p2517_p13 = pneg %p2516_p9  ;;  %p2523_p4 = por %p2522_p7, %p2521_p5 }
  0x47   : > { %p2524_p8 = pnand %p2523_p4, %p2517_p13 }
  0x49   : > { %2527 = shalt.err (!%p2524_p8)
}
  0x4a   : > { %2139 = dma.hbm_to_vmem [thread:$0]  (!%p2736_p11), %s2732_s5, 16384, %s2734_s7, %s2740_s11, %s2602_s9, %s2602_s9, %s2603_s10  }
  0x4b   : > { %p3279_p0 = scmp.ne.s32.totalorder %s3274_s23, 0 }
  0x4c   : > { %s2767_s12 = sand.u32 (!%p3279_p0), 1, %s2588_s16   ;;  %p3280_p4 = scmp.ne.s32.totalorder (!%p3279_p0), %s3272_s21, 0 }
  0x4d   : > { %207 = sbr.rel (%p3279_p0) target bundleno = 829 (0x33d), region = 36  ;;  %s2102_s20 = sshll.u32 (!%p3279_p0), %s2767_s12, 10 }
  0x4e   : > { %s210_s27 = scalar_lea.sflag (!%p3279_p0), [#allocation3], %s2767_s12  ;;  %s2773_s8 = scalar_lea.vmem (!%p3279_p0), [#allocation2], %s2102_s20 }
  0x52   : > { %2571 = dma.done.wait (%p3280_p4), %s210_s27, 16384  }
  0x53   : > { %2573 = vsyncadd (%p3280_p4), %s210_s27, 4294950912  ;;  %p3281_p8 = scmp.eq.s32.totalorder %s2655_s19, 0 }
  0x55   : > { %2575 = dma.done.wait (%p3281_p8), [#allocation6], 8192   ;;  %p3282_p7 = pmov %p3281_p8 }
  0x56   : > { %v2605_v0 = vmov 0.0   ;;  %v391_v1 = vld [vmem:[#allocation5 + $0x78] sm:$0xff]  ;;  %v390_v2 = vld [vmem:[#allocation5 + $0x70] sm:$0xff]  ;;  %v389_v3 = vld [vmem:[#allocation5 + $0x68] sm:$0xff]  ;;  %s3059_s9 = scalar_lea.vmem [#allocation8], %s2102_s20  ;;  %s2116_s7 = sshll.u32 %s2655_s19, 14 }
  0x57   : > { %2577 = vsyncadd (%p3282_p7), [#allocation6], 4294959104  ;;  %447 = vmatprep.subr.mxu0 %v2605_v0  ;;  %960 = vmatprep.mubr.f32.mxu1 %v2605_v0  ;;  %v388_v4 = vld [vmem:[#allocation5 + $0x60] sm:$0xff]  ;;  %v387_v5 = vld [vmem:[#allocation5 + $0x58] sm:$0xff]  ;;  %s2000_s11 = sshll.u32 %s3059_s9, 4  ;;  %s3216_s26 = scalar_lea.hbm %s3267_s4, %s2116_s7  ;;  %s3218_s11 = int_to_ptr.vmem [resolvable:$true] %s2000_s11 }
  0x58   : > { %448 = vmatpush1.msra.mxu0 %v391_v1  ;;  %v386_v6 = vld [vmem:[#allocation5 + $0x50] sm:$0xff]  ;;  %v385_v7 = vld [vmem:[#allocation5 + $0x48] sm:$0xff]  ;;  %v384_v9 = vld [vmem:[#allocation5 + $0x40] sm:$0xff]  ;;  %s1986_s30 = scalar_lea.sflag [#allocation4], %s2767_s12  ;;  %s2528_s19 = scalar_lea.vmem %s3218_s11, 16384 }
  0x59   : > { %449 = vmatprep.subr.mxu0 %v2605_v0  ;;  %v249_v8 = vld [vmem:[%s2773_s8 + $0x8] sm:$0xff]  ;;  %v383_v10 = vld [vmem:[#allocation5 + $0x38] sm:$0xff]  ;;  %v382_v11 = vld [vmem:[#allocation5 + $0x30] sm:$0xff]  ;;  %p2529_p11 = scmp.ne.s32.totalorder %s3218_s11, %s2528_s19  ;;  %p3283_p10 = scmp.ne.s32.totalorder %s3277_s25, 0 }
  0x5a   : > { %450 = vmatpush1.msra.mxu0 %v390_v2  ;;  %511 = vmatprep.mubr.f32.mxu0 %v249_v8  ;;  %v381_v12 = vld [vmem:[#allocation5 + $0x28] sm:$0xff]  ;;  %v380_v13 = vld [vmem:[#allocation5 + $0x20] sm:$0xff]  ;;  %v379_v14 = vld [vmem:[#allocation5 + $0x18] sm:$0xff]  ;;  %s2606_s6 = smov [#allocation8]  }
  0x5b   : > { %451 = vmatprep.subr.mxu0 %v2605_v0  ;;  %v378_v15 = vld [vmem:[#allocation5 + $0x10] sm:$0xff]  ;;  %v377_v16 = vld [vmem:[#allocation5 + $0x8] sm:$0xff]  ;;  %v376_v17 = vld [vmem:[#allocation5] sm:$0xff]  ;;  %p2530_p1 = pnand %p2529_p11, %p3283_p10  ;;  %s2532_s14 = sshll.u32 %s2606_s6, 4  ;;  %s2533_s14 = int_to_ptr.vmem [resolvable:$false] %s2532_s14 }
  0x5c   : > { %452 = vmatpush1.msra.mxu0 %v389_v3  ;;  %v407_v18 = vld [vmem:[#allocation5 + $0xf8] sm:$0xff]  ;;  %v406_v19 = vld [vmem:[#allocation5 + $0xf0] sm:$0xff]  ;;  %v405_v20 = vld [vmem:[#allocation5 + $0xe8] sm:$0xff]  ;;  %s2534_s20 = scalar_lea.vmem %s2533_s14, 32768  ;;  %p2535_p6 = scmp.lt.s32.totalorder %s3218_s11, %s2533_s14 }
  0x5d   : > { %453 = vmatprep.subr.mxu0 %v2605_v0  ;;  %v404_v21 = vld [vmem:[#allocation5 + $0xe0] sm:$0xff]  ;;  %v403_v22 = vld [vmem:[#allocation5 + $0xd8] sm:$0xff]  ;;  %v402_v23 = vld [vmem:[#allocation5 + $0xd0] sm:$0xff]  ;;  %p2531_p2 = pneg %p2530_p1  ;;  %p2536_p12 = scmp.lt.s32.totalorder %s2534_s20, %s2528_s19 }
  0x5e   : > { %454 = vmatpush1.msra.mxu0 %v388_v4  ;;  %v401_v24 = vld [vmem:[#allocation5 + $0xc8] sm:$0xff]  ;;  %v400_v25 = vld [vmem:[#allocation5 + $0xc0] sm:$0xff]  ;;  %v399_v26 = vld [vmem:[#allocation5 + $0xb8] sm:$0xff] }
  0x5f   : > { %455 = vmatprep.subr.mxu0 %v2605_v0  ;;  %v398_v27 = vld [vmem:[#allocation5 + $0xb0] sm:$0xff]  ;;  %v397_v28 = vld [vmem:[#allocation5 + $0xa8] sm:$0xff]  ;;  %v396_v29 = vld [vmem:[#allocation5 + $0xa0] sm:$0xff]  ;;  %p2537_p3 = por %p2536_p12, %p2535_p6 }
  0x60   : > { %456 = vmatpush1.msra.mxu0 %v387_v5  ;;  %v395_v30 = vld [vmem:[#allocation5 + $0x98] sm:$0xff]  ;;  %v394_v31 = vld [vmem:[#allocation5 + $0x90] sm:$0xff]  ;;  %v393_v32 = vld [vmem:[#allocation5 + $0x88] sm:$0xff] }
  0x61   : > { %457 = vmatprep.subr.mxu0 %v2605_v0  ;;  %v392_v33 = vld [vmem:[#allocation5 + $0x80] sm:$0xff]  ;;  %v251_v35 = vld [vmem:[%s2773_s8 + $0x18] sm:$0xff]  ;;  %v250_v36 = vld [vmem:[%s2773_s8 + $0x10] sm:$0xff]  ;;  %p2538_p9 = pnand %p2537_p3, %p2531_p2 }
  0x62   : > { %458 = vmatpush1.msra.mxu0 %v386_v6  ;;  %v248_v34 = vld [vmem:[%s2773_s8] sm:$0xff]  ;;  %v253_v37 = vld [vmem:[%s2773_s8 + $0x28] sm:$0xff]  ;;  %v255_v39 = vld [vmem:[%s2773_s8 + $0x38] sm:$0xff] }
  0x63   : > { %459 = vmatprep.subr.mxu0 %v2605_v0  ;;  %v252_v38 = vld [vmem:[%s2773_s8 + $0x20] sm:$0xff]  ;;  %v254_v40 = vld [vmem:[%s2773_s8 + $0x30] sm:$0xff]  ;;  %v257_v41 = vld [vmem:[%s2773_s8 + $0x48] sm:$0xff] }
  0x64   : > { %460 = vmatpush1.msra.mxu0 %v385_v7  ;;  %v256_v42 = vld [vmem:[%s2773_s8 + $0x40] sm:$0xff]  ;;  %v259_v43 = vld [vmem:[%s2773_s8 + $0x58] sm:$0xff]  ;;  %v258_v44 = vld [vmem:[%s2773_s8 + $0x50] sm:$0xff] }
  0x65   : > { %461 = vmatprep.subr.mxu0 %v2605_v0  ;;  %v261_v45 = vld [vmem:[%s2773_s8 + $0x68] sm:$0xff]  ;;  %v260_v46 = vld [vmem:[%s2773_s8 + $0x60] sm:$0xff]  ;;  %v263_v47 = vld [vmem:[%s2773_s8 + $0x78] sm:$0xff] }
  0x66   : > { %462 = vmatpush1.msra.mxu0 %v384_v9  ;;  %v262_v48 = vld [vmem:[%s2773_s8 + $0x70] sm:$0xff]  ;;  %v265_v49 = vld [vmem:[%s2773_s8 + $0x88] sm:$0xff]  ;;  %v264_v50 = vld [vmem:[%s2773_s8 + $0x80] sm:$0xff] }
  0x67   : > { %463 = vmatprep.subr.mxu0 %v2605_v0  ;;  %v267_v51 = vld [vmem:[%s2773_s8 + $0x98] sm:$0xff]  ;;  %v266_v52 = vld [vmem:[%s2773_s8 + $0x90] sm:$0xff]  ;;  %v269_v53 = vld [vmem:[%s2773_s8 + $0xa8] sm:$0xff] }
  0x68   : > { %464 = vmatpush1.msra.mxu0 %v383_v10  ;;  %v439_v54 = vld [vmem:[#allocation7 + $0xf8] sm:$0xff]  ;;  %v438_v55 = vld [vmem:[#allocation7 + $0xf0] sm:$0xff]  ;;  %v268_v56 = vld [vmem:[%s2773_s8 + $0xa0] sm:$0xff] }
  0x69   : > { %465 = vmatprep.subr.mxu0 %v2605_v0  ;;  %896 = vmatprep.subr.mxu1 %v439_v54  ;;  %v437_v57 = vld [vmem:[#allocation7 + $0xe8] sm:$0xff]  ;;  %v271_v58 = vld [vmem:[%s2773_s8 + $0xb8] sm:$0xff]  ;;  %v436_v59 = vld [vmem:[#allocation7 + $0xe0] sm:$0xff] }
  0x6a   : > { %466 = vmatpush1.msra.mxu0 %v382_v11  ;;  %897 = vmatpush1.msra.mxu1 %v438_v55  ;;  %v435_v60 = vld [vmem:[#allocation7 + $0xd8] sm:$0xff]  ;;  %v434_v61 = vld [vmem:[#allocation7 + $0xd0] sm:$0xff]  ;;  %v433_v63 = vld [vmem:[#allocation7 + $0xc8] sm:$0xff] }
  0x6b   : > { %467 = vmatprep.subr.mxu0 %v2605_v0  ;;  %898 = vmatprep.subr.mxu1 %v437_v57  ;;  %v270_v62 = vld [vmem:[%s2773_s8 + $0xb0] sm:$0xff]  ;;  %v273_v1 = vld [vmem:[%s2773_s8 + $0xc8] sm:$0xff]  ;;  %v432_v2 = vld [vmem:[#allocation7 + $0xc0] sm:$0xff] }
  0x6c   : > { %468 = vmatpush1.msra.mxu0 %v381_v12  ;;  %899 = vmatpush1.msra.mxu1 %v436_v59  ;;  %v431_v3 = vld [vmem:[#allocation7 + $0xb8] sm:$0xff]  ;;  %v430_v4 = vld [vmem:[#allocation7 + $0xb0] sm:$0xff]  ;;  %v272_v5 = vld [vmem:[%s2773_s8 + $0xc0] sm:$0xff] }
  0x6d   : > { %469 = vmatprep.subr.mxu0 %v2605_v0  ;;  %900 = vmatprep.subr.mxu1 %v435_v60  ;;  %v429_v6 = vld [vmem:[#allocation7 + $0xa8] sm:$0xff]  ;;  %v275_v7 = vld [vmem:[%s2773_s8 + $0xd8] sm:$0xff]  ;;  %v428_v8 = vld [vmem:[#allocation7 + $0xa0] sm:$0xff] }
  0x6e   : > { %470 = vmatpush1.msra.mxu0 %v380_v13  ;;  %901 = vmatpush1.msra.mxu1 %v434_v61  ;;  %v427_v9 = vld [vmem:[#allocation7 + $0x98] sm:$0xff]  ;;  %v426_v10 = vld [vmem:[#allocation7 + $0x90] sm:$0xff]  ;;  %v425_v12 = vld [vmem:[#allocation7 + $0x88] sm:$0xff] }
  0x6f   : > { %471 = vmatprep.subr.mxu0 %v2605_v0  ;;  %902 = vmatprep.subr.mxu1 %v433_v63  ;;  %v274_v11 = vld [vmem:[%s2773_s8 + $0xd0] sm:$0xff]  ;;  %v277_v13 = vld [vmem:[%s2773_s8 + $0xe8] sm:$0xff]  ;;  %v300_v55 = vld [vmem:[%s2773_s8 + $0x1a0] sm:$0xff] }
  0x70   : > { %472 = vmatpush1.msra.mxu0 %v379_v14  ;;  %903 = vmatpush1.msra.mxu1 %v432_v2  ;;  %v424_v14 = vld [vmem:[#allocation7 + $0x80] sm:$0xff]  ;;  %v301_v54 = vld [vmem:[%s2773_s8 + $0x1a8] sm:$0xff]  ;;  %v302_v57 = vld [vmem:[%s2773_s8 + $0x1b0] sm:$0xff] }
  0x71   : > { %473 = vmatprep.subr.mxu0 %v2605_v0  ;;  %904 = vmatprep.subr.mxu1 %v431_v3  ;;  %v304_v59 = vld [vmem:[%s2773_s8 + $0x1c0] sm:$0xff]  ;;  %v307_v60 = vld [vmem:[%s2773_s8 + $0x1d8] sm:$0xff]  ;;  %v306_v61 = vld [vmem:[%s2773_s8 + $0x1d0] sm:$0xff] }
  0x72   : > { %474 = vmatpush1.msra.mxu0 %v378_v15  ;;  %905 = vmatpush1.msra.mxu1 %v430_v4  ;;  %v423_v15 = vld [vmem:[#allocation7 + $0x78] sm:$0xff]  ;;  %v308_v63 = vld [vmem:[%s2773_s8 + $0x1e0] sm:$0xff]  ;;  %v310_v2 = vld [vmem:[%s2773_s8 + $0x1f0] sm:$0xff] }
  0x73   : > { %475 = vmatprep.subr.mxu0 %v2605_v0  ;;  %906 = vmatprep.subr.mxu1 %v429_v6  ;;  %v313_v3 = vld [vmem:[%s2773_s8 + $0x208] sm:$0xff]  ;;  %v312_v4 = vld [vmem:[%s2773_s8 + $0x200] sm:$0xff]  ;;  %v314_v6 = vld [vmem:[%s2773_s8 + $0x210] sm:$0xff] }
  0x74   : > { %476 = vmatpush1.msra.mxu0 %v377_v16  ;;  %907 = vmatpush1.msra.mxu1 %v428_v8  ;;  %v422_v16 = vld [vmem:[#allocation7 + $0x70] sm:$0xff]  ;;  %v316_v8 = vld [vmem:[%s2773_s8 + $0x220] sm:$0xff] }
  0x75   : > { %477 = vmatprep.subr.mxu0 %v2605_v0  ;;  %908 = vmatprep.subr.mxu1 %v427_v9  ;;  %v319_v9 = vld [vmem:[%s2773_s8 + $0x238] sm:$0xff] }
  0x76   : > { %478 = vmatpush1.msra.mxu0 %v376_v17  ;;  %909 = vmatpush1.msra.mxu1 %v426_v10  ;;  %v276_v17 = vld [vmem:[%s2773_s8 + $0xe0] sm:$0xff]  ;;  %v318_v10 = vld [vmem:[%s2773_s8 + $0x230] sm:$0xff] }
  0x77   : > { %479 = vmatprep.subr.mxu0 %v2605_v0  ;;  %910 = vmatprep.subr.mxu1 %v425_v12  ;;  %v320_v12 = vld [vmem:[%s2773_s8 + $0x240] sm:$0xff] }
  0x78   : > { %480 = vmatpush2.msra.mxu0 %v407_v18  ;;  %911 = vmatpush1.msra.mxu1 %v424_v14  ;;  %v421_v18 = vld [vmem:[#allocation7 + $0x68] sm:$0xff]  ;;  %v322_v14 = vld [vmem:[%s2773_s8 + $0x250] sm:$0xff] }
  0x79   : > { %481 = vmatprep.subr.mxu0 %v2605_v0  ;;  %912 = vmatprep.subr.mxu1 %v423_v15  ;;  %v325_v15 = vld [vmem:[%s2773_s8 + $0x268] sm:$0xff] }
  0x7a   : > { %482 = vmatpush2.msra.mxu0 %v406_v19  ;;  %v279_v19 = vld [vmem:[%s2773_s8 + $0xf8] sm:$0xff]  ;;  %913 = vmatpush1.msra.mxu1 %v422_v16  ;;  %v324_v16 = vld [vmem:[%s2773_s8 + $0x260] sm:$0xff] }
  0x7b   : > { %483 = vmatprep.subr.mxu0 %v2605_v0  ;;  %914 = vmatprep.subr.mxu1 %v421_v18  ;;  %v326_v18 = vld [vmem:[%s2773_s8 + $0x270] sm:$0xff] }
  0x7c   : > { %484 = vmatpush2.msra.mxu0 %v405_v20  ;;  %v420_v20 = vld [vmem:[#allocation7 + $0x60] sm:$0xff] }
  0x7d   : > { %485 = vmatprep.subr.mxu0 %v2605_v0  ;;  %915 = vmatpush1.msra.mxu1 %v420_v20  ;;  %v328_v20 = vld [vmem:[%s2773_s8 + $0x280] sm:$0xff] }
  0x7e   : > { %486 = vmatpush2.msra.mxu0 %v404_v21  ;;  %v419_v21 = vld [vmem:[#allocation7 + $0x58] sm:$0xff] }
  0x7f   : > { %487 = vmatprep.subr.mxu0 %v2605_v0  ;;  %916 = vmatprep.subr.mxu1 %v419_v21  ;;  %v331_v21 = vld [vmem:[%s2773_s8 + $0x298] sm:$0xff] }
  0x80   : > { %488 = vmatpush2.msra.mxu0 %v403_v22  ;;  %v418_v22 = vld [vmem:[#allocation7 + $0x50] sm:$0xff] }
  0x81   : > { %489 = vmatprep.subr.mxu0 %v2605_v0  ;;  %917 = vmatpush1.msra.mxu1 %v418_v22  ;;  %v330_v22 = vld [vmem:[%s2773_s8 + $0x290] sm:$0xff] }
  0x82   : > { %490 = vmatpush2.msra.mxu0 %v402_v23  ;;  %v278_v23 = vld [vmem:[%s2773_s8 + $0xf0] sm:$0xff] }
  0x83   : > { %491 = vmatprep.subr.mxu0 %v2605_v0 }
  0x84   : > { %492 = vmatpush2.msra.mxu0 %v401_v24  ;;  %v417_v24 = vld [vmem:[#allocation7 + $0x48] sm:$0xff] }
  0x85   : > { %493 = vmatprep.subr.mxu0 %v2605_v0  ;;  %918 = vmatprep.subr.mxu1 %v417_v24  ;;  %v332_v24 = vld [vmem:[%s2773_s8 + $0x2a0] sm:$0xff] }
  0x86   : > { %494 = vmatpush2.msra.mxu0 %v400_v25  ;;  %v281_v25 = vld [vmem:[%s2773_s8 + $0x108] sm:$0xff] }
  0x87   : > { %495 = vmatprep.subr.mxu0 %v2605_v0 }
  0x88   : > { %496 = vmatpush2.msra.mxu0 %v399_v26  ;;  %v416_v26 = vld [vmem:[#allocation7 + $0x40] sm:$0xff] }
  0x89   : > { %497 = vmatprep.subr.mxu0 %v2605_v0  ;;  %919 = vmatpush1.msra.mxu1 %v416_v26  ;;  %v334_v26 = vld [vmem:[%s2773_s8 + $0x2b0] sm:$0xff] }
  0x8a   : > { %498 = vmatpush2.msra.mxu0 %v398_v27  ;;  %v415_v27 = vld [vmem:[#allocation7 + $0x38] sm:$0xff] }
  0x8b   : > { %499 = vmatprep.subr.mxu0 %v2605_v0  ;;  %920 = vmatprep.subr.mxu1 %v415_v27  ;;  %v337_v27 = vld [vmem:[%s2773_s8 + $0x2c8] sm:$0xff] }
  0x8c   : > { %500 = vmatpush2.msra.mxu0 %v397_v28  ;;  %v414_v28 = vld [vmem:[#allocation7 + $0x30] sm:$0xff] }
  0x8d   : > { %501 = vmatprep.subr.mxu0 %v2605_v0  ;;  %921 = vmatpush1.msra.mxu1 %v414_v28  ;;  %v336_v28 = vld [vmem:[%s2773_s8 + $0x2c0] sm:$0xff] }
  0x8e   : > { %502 = vmatpush2.msra.mxu0 %v396_v29  ;;  %v280_v29 = vld [vmem:[%s2773_s8 + $0x100] sm:$0xff] }
  0x8f   : > { %503 = vmatprep.subr.mxu0 %v2605_v0 }
  0x90   : > { %504 = vmatpush2.msra.mxu0 %v395_v30  ;;  %v413_v30 = vld [vmem:[#allocation7 + $0x28] sm:$0xff] }
  0x91   : > { %505 = vmatprep.subr.mxu0 %v2605_v0  ;;  %922 = vmatprep.subr.mxu1 %v413_v30  ;;  %v338_v30 = vld [vmem:[%s2773_s8 + $0x2d0] sm:$0xff] }
  0x92   : > { %506 = vmatpush2.msra.mxu0 %v394_v31  ;;  %v283_v31 = vld [vmem:[%s2773_s8 + $0x118] sm:$0xff] }
  0x93   : > { %507 = vmatprep.subr.mxu0 %v2605_v0 }
  0x94   : > { %508 = vmatpush2.msra.mxu0 %v393_v32  ;;  %v412_v32 = vld [vmem:[#allocation7 + $0x20] sm:$0xff] }
  0x95   : > { %509 = vmatprep.subr.mxu0 %v2605_v0  ;;  %923 = vmatpush1.msra.mxu1 %v412_v32  ;;  %v340_v32 = vld [vmem:[%s2773_s8 + $0x2e0] sm:$0xff] }
  0x96   : > { %510 = vmatpush2.msra.mxu0 %v392_v33  ;;  %v411_v33 = vld [vmem:[#allocation7 + $0x18] sm:$0xff] }
  0x97   : > { %512 = vmatmul.mubr.f32.vlgmr.msra.gmra.mxu0 %v248_v34  ;;  %v282_v34 = vld [vmem:[%s2773_s8 + $0x110] sm:$0xff]  ;;  %924 = vmatprep.subr.mxu1 %v411_v33  ;;  %v343_v33 = vld [vmem:[%s2773_s8 + $0x2f8] sm:$0xff] }
  0x98   : > { %516 = vmatprep.mubr.f32.mxu0 %v251_v35  ;;  %v410_v35 = vld [vmem:[#allocation7 + $0x10] sm:$0xff] }
  0x99   : > { %925 = vmatpush1.msra.mxu1 %v410_v35  ;;  %v345_v35 = vld [vmem:[%s2773_s8 + $0x308] sm:$0xff] }
  0x9b   : > { %517 = vmatmul.mubr.f32.gmra.mxu0 %v250_v36  ;;  %v285_v36 = vld [vmem:[%s2773_s8 + $0x128] sm:$0xff] }
  0x9c   : > { %521 = vmatprep.mubr.f32.mxu0 %v253_v37  ;;  %v409_v37 = vld [vmem:[#allocation7 + $0x8] sm:$0xff] }
  0x9d   : > { %926 = vmatprep.subr.mxu1 %v409_v37  ;;  %v2917_v37 = vld [vmem:[%s3266_s3] ss:$0 sm:$0xff] }
  0x9f   : > { %522 = vmatmul.mubr.f32.gmra.mxu0 %v252_v38  ;;  %v408_v38 = vld [vmem:[#allocation7] sm:$0xff] }
  0xa0   : > { %526 = vmatprep.mubr.f32.mxu0 %v255_v39  ;;  %927 = vmatpush1.msra.mxu1 %v408_v38  ;;  %v284_v39 = vld [vmem:[%s2773_s8 + $0x120] sm:$0xff]  ;;  %v347_v38 = vld [vmem:[%s2773_s8 + $0x318] sm:$0xff] }
  0xa3   : > { %527 = vmatmul.mubr.f32.gmra.mxu0 %v254_v40  ;;  %v287_v40 = vld [vmem:[%s2773_s8 + $0x138] sm:$0xff] }
  0xa4   : > { %531 = vmatprep.mubr.f32.mxu0 %v257_v41  ;;  %v286_v41 = vld [vmem:[%s2773_s8 + $0x130] sm:$0xff] }
  0xa7   : > { %532 = vmatmul.mubr.f32.gmra.mxu0 %v256_v42  ;;  %v289_v42 = vld [vmem:[%s2773_s8 + $0x148] sm:$0xff] }
  0xa8   : > { %536 = vmatprep.mubr.f32.mxu0 %v259_v43  ;;  %v288_v43 = vld [vmem:[%s2773_s8 + $0x140] sm:$0xff] }
  0xab   : > { %537 = vmatmul.mubr.f32.gmra.mxu0 %v258_v44  ;;  %v291_v44 = vld [vmem:[%s2773_s8 + $0x158] sm:$0xff] }
  0xac   : > { %541 = vmatprep.mubr.f32.mxu0 %v261_v45  ;;  %v290_v45 = vld [vmem:[%s2773_s8 + $0x150] sm:$0xff] }
  0xaf   : > { %542 = vmatmul.mubr.f32.gmra.mxu0 %v260_v46  ;;  %v293_v46 = vld [vmem:[%s2773_s8 + $0x168] sm:$0xff] }
  0xb0   : > { %546 = vmatprep.mubr.f32.mxu0 %v263_v47  ;;  %v292_v47 = vld [vmem:[%s2773_s8 + $0x160] sm:$0xff] }
  0xb3   : > { %547 = vmatmul.mubr.f32.gmra.mxu0 %v262_v48  ;;  %v295_v48 = vld [vmem:[%s2773_s8 + $0x178] sm:$0xff] }
  0xb4   : > { %551 = vmatprep.mubr.f32.mxu0 %v265_v49  ;;  %v294_v49 = vld [vmem:[%s2773_s8 + $0x170] sm:$0xff] }
  0xb7   : > { %552 = vmatmul.mubr.f32.gmra.mxu0 %v264_v50  ;;  %v297_v50 = vld [vmem:[%s2773_s8 + $0x188] sm:$0xff] }
  0xb8   : > { %556 = vmatprep.mubr.f32.mxu0 %v267_v51  ;;  %v296_v51 = vld [vmem:[%s2773_s8 + $0x180] sm:$0xff] }
  0xbb   : > { %557 = vmatmul.mubr.f32.gmra.mxu0 %v266_v52  ;;  %v299_v52 = vld [vmem:[%s2773_s8 + $0x198] sm:$0xff] }
  0xbc   : > { %561 = vmatprep.mubr.f32.mxu0 %v269_v53  ;;  %v298_v53 = vld [vmem:[%s2773_s8 + $0x190] sm:$0xff] }
  0xbf   : > { %562 = vmatmul.mubr.f32.gmra.mxu0 %v268_v56  ;;  %v303_v56 = vld [vmem:[%s2773_s8 + $0x1b8] sm:$0xff] }
  0xc0   : > { %566 = vmatprep.mubr.f32.mxu0 %v271_v58  ;;  %v305_v58 = vld [vmem:[%s2773_s8 + $0x1c8] sm:$0xff] }
  0xc3   : > { %567 = vmatmul.mubr.f32.gmra.mxu0 %v270_v62  ;;  %v309_v62 = vld [vmem:[%s2773_s8 + $0x1e8] sm:$0xff] }
  0xc4   : > { %571 = vmatprep.mubr.f32.mxu0 %v273_v1  ;;  %v311_v1 = vld [vmem:[%s2773_s8 + $0x1f8] sm:$0xff] }
  0xc7   : > { %572 = vmatmul.mubr.f32.gmra.mxu0 %v272_v5  ;;  %v315_v5 = vld [vmem:[%s2773_s8 + $0x218] sm:$0xff] }
  0xc8   : > { %576 = vmatprep.mubr.f32.mxu0 %v275_v7  ;;  %v317_v7 = vld [vmem:[%s2773_s8 + $0x228] sm:$0xff] }
  0xcb   : > { %577 = vmatmul.mubr.f32.gmra.mxu0 %v274_v11  ;;  %v321_v11 = vld [vmem:[%s2773_s8 + $0x248] sm:$0xff] }
  0xcc   : > { %581 = vmatprep.mubr.f32.mxu0 %v277_v13  ;;  %v323_v13 = vld [vmem:[%s2773_s8 + $0x258] sm:$0xff] }
  0xcf   : > { %582 = vmatmul.mubr.f32.gmra.mxu0 %v276_v17  ;;  %v327_v17 = vld [vmem:[%s2773_s8 + $0x278] sm:$0xff] }
  0xd0   : > { %586 = vmatprep.mubr.f32.mxu0 %v279_v19  ;;  %v329_v19 = vld [vmem:[%s2773_s8 + $0x288] sm:$0xff] }
  0xd3   : > { %587 = vmatmul.mubr.f32.gmra.mxu0 %v278_v23  ;;  %v333_v23 = vld [vmem:[%s2773_s8 + $0x2a8] sm:$0xff] }
  0xd4   : > { %591 = vmatprep.mubr.f32.mxu0 %v281_v25  ;;  %v335_v25 = vld [vmem:[%s2773_s8 + $0x2b8] sm:$0xff] }
  0xd7   : > { %592 = vmatmul.mubr.f32.gmra.mxu0 %v280_v29  ;;  %v339_v29 = vld [vmem:[%s2773_s8 + $0x2d8] sm:$0xff] }
  0xd8   : > { %596 = vmatprep.mubr.f32.mxu0 %v283_v31  ;;  %v341_v31 = vld [vmem:[%s2773_s8 + $0x2e8] sm:$0xff] }
  0xdb   : > { %597 = vmatmul.mubr.f32.gmra.mxu0 %v282_v34  ;;  %v342_v34 = vld [vmem:[%s2773_s8 + $0x2f0] sm:$0xff] }
  0xdc   : > { %601 = vmatprep.mubr.f32.mxu0 %v285_v36  ;;  %v344_v36 = vld [vmem:[%s2773_s8 + $0x300] sm:$0xff] }
  0xdf   : > { %602 = vmatmul.mubr.f32.gmra.mxu0 %v284_v39 }
  0xe0   : > { %606 = vmatprep.mubr.f32.mxu0 %v287_v40 }
  0xe3   : > { %607 = vmatmul.mubr.f32.gmra.mxu0 %v286_v41  ;;  %v346_v41 = vld [vmem:[%s2773_s8 + $0x310] sm:$0xff] }
  0xe4   : > { %611 = vmatprep.mubr.f32.mxu0 %v289_v42 }
  0xe7   : > { %612 = vmatmul.mubr.f32.gmra.mxu0 %v288_v43  ;;  %v349_v43 = vld [vmem:[%s2773_s8 + $0x328] sm:$0xff] }
  0xe8   : > { %616 = vmatprep.mubr.f32.mxu0 %v291_v44 }
  0xeb   : > { %617 = vmatmul.mubr.f32.gmra.mxu0 %v290_v45 }
  0xec   : > { %621 = vmatprep.mubr.f32.mxu0 %v293_v46 }
  0xef   : > { %622 = vmatmul.mubr.f32.gmra.mxu0 %v292_v47  ;;  %v348_v47 = vld [vmem:[%s2773_s8 + $0x320] sm:$0xff] }
  0xf0   : > { %626 = vmatprep.mubr.f32.mxu0 %v295_v48 }
  0xf3   : > { %627 = vmatmul.mubr.f32.gmra.mxu0 %v294_v49  ;;  %v351_v49 = vld [vmem:[%s2773_s8 + $0x338] sm:$0xff] }
  0xf4   : > { %631 = vmatprep.mubr.f32.mxu0 %v297_v50 }
  0xf7   : > { %632 = vmatmul.mubr.f32.gmra.mxu0 %v296_v51 }
  0xf8   : > { %636 = vmatprep.mubr.f32.mxu0 %v299_v52 }
  0xfb   : > { %637 = vmatmul.mubr.f32.gmra.mxu0 %v298_v53  ;;  %v350_v53 = vld [vmem:[%s2773_s8 + $0x330] sm:$0xff] }
  0xfc   : > { %641 = vmatprep.mubr.f32.mxu0 %v301_v54 }
  0xff   : > { %642 = vmatmul.mubr.f32.gmra.mxu0 %v300_v55  ;;  %v353_v55 = vld [vmem:[%s2773_s8 + $0x348] sm:$0xff] }
 0x100   : > { %646 = vmatprep.mubr.f32.mxu0 %v303_v56 }
 0x103   : > { %647 = vmatmul.mubr.f32.gmra.mxu0 %v302_v57 }
 0x104   : > { %651 = vmatprep.mubr.f32.mxu0 %v305_v58 }
 0x107   : > { %652 = vmatmul.mubr.f32.gmra.mxu0 %v304_v59  ;;  %v352_v59 = vld [vmem:[%s2773_s8 + $0x340] sm:$0xff] }
 0x108   : > { %656 = vmatprep.mubr.f32.mxu0 %v307_v60 }
 0x10b   : > { %657 = vmatmul.mubr.f32.gmra.mxu0 %v306_v61  ;;  %v355_v61 = vld [vmem:[%s2773_s8 + $0x358] sm:$0xff] }
 0x10c   : > { %661 = vmatprep.mubr.f32.mxu0 %v309_v62 }
 0x10f   : > { %662 = vmatmul.mubr.f32.gmra.mxu0 %v308_v63 }
 0x110   : > { %666 = vmatprep.mubr.f32.mxu0 %v311_v1 }
 0x113   : > { %667 = vmatmul.mubr.f32.gmra.mxu0 %v310_v2  ;;  %v354_v2 = vld [vmem:[%s2773_s8 + $0x350] sm:$0xff] }
 0x114   : > { %671 = vmatprep.mubr.f32.mxu0 %v313_v3 }
 0x117   : > { %672 = vmatmul.mubr.f32.gmra.mxu0 %v312_v4  ;;  %v357_v4 = vld [vmem:[%s2773_s8 + $0x368] sm:$0xff] }
 0x118   : > { %676 = vmatprep.mubr.f32.mxu0 %v315_v5 }
 0x11b   : > { %677 = vmatmul.mubr.f32.gmra.mxu0 %v314_v6 }
 0x11c   : > { %681 = vmatprep.mubr.f32.mxu0 %v317_v7 }
 0x11f   : > { %682 = vmatmul.mubr.f32.gmra.mxu0 %v316_v8  ;;  %v356_v8 = vld [vmem:[%s2773_s8 + $0x360] sm:$0xff] }
 0x120   : > { %686 = vmatprep.mubr.f32.mxu0 %v319_v9 }
 0x123   : > { %687 = vmatmul.mubr.f32.gmra.mxu0 %v318_v10  ;;  %v359_v10 = vld [vmem:[%s2773_s8 + $0x378] sm:$0xff] }
 0x124   : > { %691 = vmatprep.mubr.f32.mxu0 %v321_v11 }
 0x127   : > { %692 = vmatmul.mubr.f32.gmra.mxu0 %v320_v12 }
 0x128   : > { %696 = vmatprep.mubr.f32.mxu0 %v323_v13 }
 0x12b   : > { %697 = vmatmul.mubr.f32.gmra.mxu0 %v322_v14  ;;  %v358_v14 = vld [vmem:[%s2773_s8 + $0x370] sm:$0xff] }
 0x12c   : > { %701 = vmatprep.mubr.f32.mxu0 %v325_v15 }
 0x12f   : > { %702 = vmatmul.mubr.f32.gmra.mxu0 %v324_v16  ;;  %v361_v16 = vld [vmem:[%s2773_s8 + $0x388] sm:$0xff] }
 0x130   : > { %706 = vmatprep.mubr.f32.mxu0 %v327_v17 }
 0x133   : > { %707 = vmatmul.mubr.f32.gmra.mxu0 %v326_v18 }
 0x134   : > { %711 = vmatprep.mubr.f32.mxu0 %v329_v19 }
 0x137   : > { %712 = vmatmul.mubr.f32.gmra.mxu0 %v328_v20  ;;  %v360_v20 = vld [vmem:[%s2773_s8 + $0x380] sm:$0xff] }
 0x138   : > { %716 = vmatprep.mubr.f32.mxu0 %v331_v21 }
 0x13b   : > { %717 = vmatmul.mubr.f32.gmra.mxu0 %v330_v22  ;;  %v363_v22 = vld [vmem:[%s2773_s8 + $0x398] sm:$0xff] }
 0x13c   : > { %721 = vmatprep.mubr.f32.mxu0 %v333_v23 }
 0x13f   : > { %722 = vmatmul.mubr.f32.gmra.mxu0 %v332_v24 }
 0x140   : > { %726 = vmatprep.mubr.f32.mxu0 %v335_v25 }
 0x143   : > { %727 = vmatmul.mubr.f32.gmra.mxu0 %v334_v26  ;;  %v362_v26 = vld [vmem:[%s2773_s8 + $0x390] sm:$0xff] }
 0x144   : > { %731 = vmatprep.mubr.f32.mxu0 %v337_v27 }
 0x147   : > { %732 = vmatmul.mubr.f32.gmra.mxu0 %v336_v28  ;;  %v365_v28 = vld [vmem:[%s2773_s8 + $0x3a8] sm:$0xff] }
 0x148   : > { %736 = vmatprep.mubr.f32.mxu0 %v339_v29 }
 0x14b   : > { %737 = vmatmul.mubr.f32.gmra.mxu0 %v338_v30 }
 0x14c   : > { %741 = vmatprep.mubr.f32.mxu0 %v341_v31 }
 0x14f   : > { %742 = vmatmul.mubr.f32.gmra.mxu0 %v340_v32  ;;  %v364_v32 = vld [vmem:[%s2773_s8 + $0x3a0] sm:$0xff] }
 0x150   : > { %746 = vmatprep.mubr.f32.mxu0 %v343_v33 }
 0x153   : > { %747 = vmatmul.mubr.f32.gmra.mxu0 %v342_v34  ;;  %v367_v34 = vld [vmem:[%s2773_s8 + $0x3b8] sm:$0xff] }
 0x154   : > { %751 = vmatprep.mubr.f32.mxu0 %v345_v35 }
 0x157   : > { %v513_v39 = vpop.f32.mrf.mxu0  ;;  %752 = vmatmul.mubr.f32.gmra.mxu0 %v344_v36 }
 0x158   : > { %v514_v40 = vadd.f32 %v2917_v37, %v513_v39  ;;  %756 = vmatprep.mubr.f32.mxu0 %v347_v38  ;;  %v366_v39 = vld [vmem:[%s2773_s8 + $0x3b0] sm:$0xff] }
 0x159   : > { %v515_v42 = vpop.f32.mrf.mxu0 }
 0x15a   : > { %v832_v44 = vmax.f32 %v514_v40, 0.0 }
 0x15b   : > { %v518_v45 = vpop.f32.mrf.mxu0  ;;  %757 = vmatmul.mubr.f32.gmra.mxu0 %v346_v41  ;;  %v369_v41 = vld [vmem:[%s2773_s8 + $0x3c8] sm:$0xff] }
 0x15c   : > { %v519_v46 = vadd.f32 %v2917_v37, %v518_v45  ;;  %961 = vmatmul.mubr.f32.vlgmr.msra.gmra.mxu1 %v832_v44  ;;  %761 = vmatprep.mubr.f32.mxu0 %v349_v43  ;;  %v368_v45 = vld [vmem:[%s2773_s8 + $0x3c0] sm:$0xff] }
 0x15d   : > { %v520_v48 = vpop.f32.mrf.mxu0  ;;  %966 = vmatprep.mubr.f32.mxu1 %v2605_v0 }
 0x15e   : > { %v833_v50 = vmax.f32 %v519_v46, 0.0 }
 0x15f   : > { %v523_v51 = vpop.f32.mrf.mxu0  ;;  %762 = vmatmul.mubr.f32.gmra.mxu0 %v348_v47  ;;  %v371_v47 = vld [vmem:[%s2773_s8 + $0x3d8] sm:$0xff] }
 0x160   : > { %v524_v52 = vadd.f32 %v2917_v37, %v523_v51  ;;  %967 = vmatmul.mubr.f32.gmra.mxu1 %v833_v50  ;;  %766 = vmatprep.mubr.f32.mxu0 %v351_v49  ;;  %v370_v51 = vld [vmem:[%s2773_s8 + $0x3d0] sm:$0xff] }
 0x161   : > { %v525_v54 = vpop.f32.mrf.mxu0  ;;  %972 = vmatprep.mubr.f32.mxu1 %v2605_v0 }
 0x162   : > { %v834_v56 = vmax.f32 %v524_v52, 0.0 }
 0x163   : > { %v528_v57 = vpop.f32.mrf.mxu0  ;;  %767 = vmatmul.mubr.f32.gmra.mxu0 %v350_v53  ;;  %v373_v53 = vld [vmem:[%s2773_s8 + $0x3e8] sm:$0xff] }
 0x164   : > { %v529_v58 = vadd.f32 %v2917_v37, %v528_v57  ;;  %973 = vmatmul.mubr.f32.gmra.mxu1 %v834_v56  ;;  %771 = vmatprep.mubr.f32.mxu0 %v353_v55  ;;  %v372_v57 = vld [vmem:[%s2773_s8 + $0x3e0] sm:$0xff] }
 0x165   : > { %v530_v60 = vpop.f32.mrf.mxu0  ;;  %978 = vmatprep.mubr.f32.mxu1 %v2605_v0 }
 0x166   : > { %v835_v62 = vmax.f32 %v529_v58, 0.0 }
 0x167   : > { %v533_v63 = vpop.f32.mrf.mxu0  ;;  %772 = vmatmul.mubr.f32.gmra.mxu0 %v352_v59  ;;  %v375_v59 = vld [vmem:[%s2773_s8 + $0x3f8] sm:$0xff] }
 0x168   : > { %v534_v1 = vadd.f32 %v2917_v37, %v533_v63  ;;  %979 = vmatmul.mubr.f32.gmra.mxu1 %v835_v62  ;;  %776 = vmatprep.mubr.f32.mxu0 %v355_v61  ;;  %v374_v63 = vld [vmem:[%s2773_s8 + $0x3f0] sm:$0xff] }
 0x169   : > { %v535_v3 = vpop.f32.mrf.mxu0  ;;  %984 = vmatprep.mubr.f32.mxu1 %v2605_v0 }
 0x16a   : > { %v836_v5 = vmax.f32 %v534_v1, 0.0 }
 0x16b   : > { %v538_v6 = vpop.f32.mrf.mxu0  ;;  %777 = vmatmul.mubr.f32.gmra.mxu0 %v354_v2 }
 0x16c   : > { %v539_v7 = vadd.f32 %v2917_v37, %v538_v6  ;;  %985 = vmatmul.mubr.f32.gmra.mxu1 %v836_v5  ;;  %781 = vmatprep.mubr.f32.mxu0 %v357_v4 }
 0x16d   : > { %v540_v9 = vpop.f32.mrf.mxu0  ;;  %990 = vmatprep.mubr.f32.mxu1 %v2605_v0 }
 0x16e   : > { %v837_v11 = vmax.f32 %v539_v7, 0.0 }
 0x16f   : > { %v543_v12 = vpop.f32.mrf.mxu0  ;;  %782 = vmatmul.mubr.f32.gmra.mxu0 %v356_v8 }
 0x170   : > { %v544_v13 = vadd.f32 %v2917_v37, %v543_v12  ;;  %991 = vmatmul.mubr.f32.gmra.mxu1 %v837_v11  ;;  %786 = vmatprep.mubr.f32.mxu0 %v359_v10 }
 0x171   : > { %v545_v15 = vpop.f32.mrf.mxu0  ;;  %996 = vmatprep.mubr.f32.mxu1 %v2605_v0 }
 0x172   : > { %v838_v17 = vmax.f32 %v544_v13, 0.0 }
 0x173   : > { %v548_v18 = vpop.f32.mrf.mxu0  ;;  %787 = vmatmul.mubr.f32.gmra.mxu0 %v358_v14 }
 0x174   : > { %v549_v19 = vadd.f32 %v2917_v37, %v548_v18  ;;  %997 = vmatmul.mubr.f32.gmra.mxu1 %v838_v17  ;;  %791 = vmatprep.mubr.f32.mxu0 %v361_v16 }
 0x175   : > { %v550_v21 = vpop.f32.mrf.mxu0  ;;  %1002 = vmatprep.mubr.f32.mxu1 %v2605_v0 }
 0x176   : > { %v839_v23 = vmax.f32 %v549_v19, 0.0 }
 0x177   : > { %v553_v24 = vpop.f32.mrf.mxu0  ;;  %792 = vmatmul.mubr.f32.gmra.mxu0 %v360_v20 }
 0x178   : > { %v554_v25 = vadd.f32 %v2917_v37, %v553_v24  ;;  %1003 = vmatmul.mubr.f32.gmra.mxu1 %v839_v23  ;;  %796 = vmatprep.mubr.f32.mxu0 %v363_v22 }
 0x179   : > { %v555_v27 = vpop.f32.mrf.mxu0  ;;  %1008 = vmatprep.mubr.f32.mxu1 %v2605_v0 }
 0x17a   : > { %v840_v29 = vmax.f32 %v554_v25, 0.0 }
 0x17b   : > { %v558_v30 = vpop.f32.mrf.mxu0  ;;  %797 = vmatmul.mubr.f32.gmra.mxu0 %v362_v26 }
 0x17c   : > { %v559_v31 = vadd.f32 %v2917_v37, %v558_v30  ;;  %1009 = vmatmul.mubr.f32.gmra.mxu1 %v840_v29  ;;  %801 = vmatprep.mubr.f32.mxu0 %v365_v28 }
 0x17d   : > { %v560_v33 = vpop.f32.mrf.mxu0  ;;  %1014 = vmatprep.mubr.f32.mxu1 %v2605_v0 }
 0x17e   : > { %v841_v35 = vmax.f32 %v559_v31, 0.0 }
 0x17f   : > { %v563_v36 = vpop.f32.mrf.mxu0  ;;  %802 = vmatmul.mubr.f32.gmra.mxu0 %v364_v32 }
 0x180   : > { %v564_v38 = vadd.f32 %v2917_v37, %v563_v36  ;;  %1015 = vmatmul.mubr.f32.gmra.mxu1 %v841_v35  ;;  %806 = vmatprep.mubr.f32.mxu0 %v367_v34 }
 0x181   : > { %v565_v40 = vpop.f32.mrf.mxu0  ;;  %1020 = vmatprep.mubr.f32.mxu1 %v2605_v0 }
 0x182   : > { %v842_v42 = vmax.f32 %v564_v38, 0.0 }
 0x183   : > { %v568_v43 = vpop.f32.mrf.mxu0  ;;  %807 = vmatmul.mubr.f32.gmra.mxu0 %v366_v39 }
 0x184   : > { %v569_v44 = vadd.f32 %v2917_v37, %v568_v43  ;;  %1021 = vmatmul.mubr.f32.gmra.mxu1 %v842_v42  ;;  %811 = vmatprep.mubr.f32.mxu0 %v369_v41 }
 0x185   : > { %v570_v46 = vpop.f32.mrf.mxu0  ;;  %1026 = vmatprep.mubr.f32.mxu1 %v2605_v0 }
 0x186   : > { %v843_v48 = vmax.f32 %v569_v44, 0.0 }
 0x187   : > { %v573_v49 = vpop.f32.mrf.mxu0  ;;  %812 = vmatmul.mubr.f32.gmra.mxu0 %v368_v45 }
 0x188   : > { %v574_v50 = vadd.f32 %v2917_v37, %v573_v49  ;;  %1027 = vmatmul.mubr.f32.gmra.mxu1 %v843_v48  ;;  %816 = vmatprep.mubr.f32.mxu0 %v371_v47 }
 0x189   : > { %v575_v52 = vpop.f32.mrf.mxu0  ;;  %1032 = vmatprep.mubr.f32.mxu1 %v2605_v0 }
 0x18a   : > { %v844_v54 = vmax.f32 %v574_v50, 0.0 }
 0x18b   : > { %v578_v55 = vpop.f32.mrf.mxu0  ;;  %817 = vmatmul.mubr.f32.gmra.mxu0 %v370_v51 }
 0x18c   : > { %v579_v56 = vadd.f32 %v2917_v37, %v578_v55  ;;  %1033 = vmatmul.mubr.f32.gmra.mxu1 %v844_v54  ;;  %821 = vmatprep.mubr.f32.mxu0 %v373_v53 }
 0x18d   : > { %v580_v58 = vpop.f32.mrf.mxu0  ;;  %1038 = vmatprep.mubr.f32.mxu1 %v2605_v0 }
 0x18e   : > { %v845_v60 = vmax.f32 %v579_v56, 0.0 }
 0x18f   : > { %v583_v61 = vpop.f32.mrf.mxu0  ;;  %822 = vmatmul.mubr.f32.gmra.mxu0 %v372_v57 }
 0x190   : > { %v584_v62 = vadd.f32 %v2917_v37, %v583_v61  ;;  %1039 = vmatmul.mubr.f32.gmra.mxu1 %v845_v60  ;;  %826 = vmatprep.mubr.f32.mxu0 %v375_v59 }
 0x191   : > { %v585_v1 = vpop.f32.mrf.mxu0  ;;  %1044 = vmatprep.mubr.f32.mxu1 %v2605_v0 }
 0x192   : > { %v846_v2 = vmax.f32 %v584_v62, 0.0 }
 0x193   : > { %v588_v3 = vpop.f32.mrf.mxu0  ;;  %827 = vmatmul.mubr.f32.gmra.mxu0 %v374_v63 }
 0x194   : > { %v589_v4 = vadd.f32 %v2917_v37, %v588_v3  ;;  %1045 = vmatmul.mubr.f32.gmra.mxu1 %v846_v2 }
 0x195   : > { %v590_v5 = vpop.f32.mrf.mxu0  ;;  %1050 = vmatprep.mubr.f32.mxu1 %v2605_v0 }
 0x196   : > { %v847_v6 = vmax.f32 %v589_v4, 0.0 }
 0x197   : > { %v593_v7 = vpop.f32.mrf.mxu0 }
 0x198   : > { %v594_v8 = vadd.f32 %v2917_v37, %v593_v7  ;;  %1051 = vmatmul.mubr.f32.gmra.mxu1 %v847_v6 }
 0x199   : > { %v595_v9 = vpop.f32.mrf.mxu0  ;;  %1056 = vmatprep.mubr.f32.mxu1 %v2605_v0 }
 0x19a   : > { %v848_v10 = vmax.f32 %v594_v8, 0.0 }
 0x19b   : > { %v598_v11 = vpop.f32.mrf.mxu0 }
 0x19c   : > { %v599_v12 = vadd.f32 %v2917_v37, %v598_v11  ;;  %1057 = vmatmul.mubr.f32.gmra.mxu1 %v848_v10 }
 0x19d   : > { %v600_v13 = vpop.f32.mrf.mxu0  ;;  %1062 = vmatprep.mubr.f32.mxu1 %v2605_v0 }
 0x19e   : > { %v849_v14 = vmax.f32 %v599_v12, 0.0 }
 0x19f   : > { %v603_v15 = vpop.f32.mrf.mxu0 }
 0x1a0   : > { %v604_v16 = vadd.f32 %v2917_v37, %v603_v15  ;;  %1063 = vmatmul.mubr.f32.gmra.mxu1 %v849_v14 }
 0x1a1   : > { %v605_v17 = vpop.f32.mrf.mxu0  ;;  %1068 = vmatprep.mubr.f32.mxu1 %v2605_v0 }
 0x1a2   : > { %v850_v18 = vmax.f32 %v604_v16, 0.0 }
 0x1a3   : > { %v608_v19 = vpop.f32.mrf.mxu0 }
 0x1a4   : > { %v609_v20 = vadd.f32 %v2917_v37, %v608_v19  ;;  %1069 = vmatmul.mubr.f32.gmra.mxu1 %v850_v18 }
 0x1a5   : > { %v610_v21 = vpop.f32.mrf.mxu0  ;;  %1074 = vmatprep.mubr.f32.mxu1 %v2605_v0 }
 0x1a6   : > { %v851_v22 = vmax.f32 %v609_v20, 0.0 }
 0x1a7   : > { %v613_v23 = vpop.f32.mrf.mxu0 }
 0x1a8   : > { %v614_v24 = vadd.f32 %v2917_v37, %v613_v23  ;;  %1075 = vmatmul.mubr.f32.gmra.mxu1 %v851_v22 }
 0x1a9   : > { %v615_v25 = vpop.f32.mrf.mxu0  ;;  %1080 = vmatprep.mubr.f32.mxu1 %v2605_v0 }
 0x1aa   : > { %v852_v26 = vmax.f32 %v614_v24, 0.0 }
 0x1ab   : > { %v618_v27 = vpop.f32.mrf.mxu0 }
 0x1ac   : > { %v619_v28 = vadd.f32 %v2917_v37, %v618_v27  ;;  %1081 = vmatmul.mubr.f32.gmra.mxu1 %v852_v26 }
 0x1ad   : > { %v620_v29 = vpop.f32.mrf.mxu0  ;;  %1086 = vmatprep.mubr.f32.mxu1 %v2605_v0 }
 0x1ae   : > { %v853_v30 = vmax.f32 %v619_v28, 0.0 }
 0x1af   : > { %v623_v31 = vpop.f32.mrf.mxu0 }
 0x1b0   : > { %v624_v32 = vadd.f32 %v2917_v37, %v623_v31  ;;  %1087 = vmatmul.mubr.f32.gmra.mxu1 %v853_v30 }
 0x1b1   : > { %v625_v33 = vpop.f32.mrf.mxu0  ;;  %1092 = vmatprep.mubr.f32.mxu1 %v2605_v0 }
 0x1b2   : > { %v854_v34 = vmax.f32 %v624_v32, 0.0 }
 0x1b3   : > { %v628_v35 = vpop.f32.mrf.mxu0 }
 0x1b4   : > { %v629_v36 = vadd.f32 %v2917_v37, %v628_v35  ;;  %1093 = vmatmul.mubr.f32.gmra.mxu1 %v854_v34 }
 0x1b5   : > { %v630_v38 = vpop.f32.mrf.mxu0  ;;  %1098 = vmatprep.mubr.f32.mxu1 %v2605_v0 }
 0x1b6   : > { %v855_v39 = vmax.f32 %v629_v36, 0.0 }
 0x1b7   : > { %v633_v40 = vpop.f32.mrf.mxu0 }
 0x1b8   : > { %v634_v41 = vadd.f32 %v2917_v37, %v633_v40  ;;  %1099 = vmatmul.mubr.f32.gmra.mxu1 %v855_v39 }
 0x1b9   : > { %v635_v42 = vpop.f32.mrf.mxu0  ;;  %1104 = vmatprep.mubr.f32.mxu1 %v2605_v0 }
 0x1ba   : > { %v856_v43 = vmax.f32 %v634_v41, 0.0 }
 0x1bb   : > { %v638_v44 = vpop.f32.mrf.mxu0 }
 0x1bc   : > { %v639_v45 = vadd.f32 %v2917_v37, %v638_v44  ;;  %1105 = vmatmul.mubr.f32.gmra.mxu1 %v856_v43 }
 0x1bd   : > { %v640_v46 = vpop.f32.mrf.mxu0  ;;  %1110 = vmatprep.mubr.f32.mxu1 %v2605_v0 }
 0x1be   : > { %v857_v47 = vmax.f32 %v639_v45, 0.0 }
 0x1bf   : > { %v643_v48 = vpop.f32.mrf.mxu0 }
 0x1c0   : > { %v644_v49 = vadd.f32 %v2917_v37, %v643_v48  ;;  %1111 = vmatmul.mubr.f32.gmra.mxu1 %v857_v47 }
 0x1c1   : > { %v645_v50 = vpop.f32.mrf.mxu0  ;;  %1116 = vmatprep.mubr.f32.mxu1 %v2605_v0 }
 0x1c2   : > { %v858_v51 = vmax.f32 %v644_v49, 0.0 }
 0x1c3   : > { %v648_v52 = vpop.f32.mrf.mxu0 }
 0x1c4   : > { %v649_v53 = vadd.f32 %v2917_v37, %v648_v52  ;;  %1117 = vmatmul.mubr.f32.gmra.mxu1 %v858_v51 }
 0x1c5   : > { %v650_v54 = vpop.f32.mrf.mxu0  ;;  %1122 = vmatprep.mubr.f32.mxu1 %v2605_v0 }
 0x1c6   : > { %v859_v55 = vmax.f32 %v649_v53, 0.0 }
 0x1c7   : > { %v653_v56 = vpop.f32.mrf.mxu0 }
 0x1c8   : > { %v654_v57 = vadd.f32 %v2917_v37, %v653_v56  ;;  %1123 = vmatmul.mubr.f32.gmra.mxu1 %v859_v55 }
 0x1c9   : > { %v655_v58 = vpop.f32.mrf.mxu0  ;;  %1128 = vmatprep.mubr.f32.mxu1 %v2605_v0 }
 0x1ca   : > { %v860_v59 = vmax.f32 %v654_v57, 0.0 }
 0x1cb   : > { %v658_v60 = vpop.f32.mrf.mxu0 }
 0x1cc   : > { %v659_v61 = vadd.f32 %v2917_v37, %v658_v60  ;;  %1129 = vmatmul.mubr.f32.gmra.mxu1 %v860_v59 }
 0x1cd   : > { %v660_v62 = vpop.f32.mrf.mxu0  ;;  %1134 = vmatprep.mubr.f32.mxu1 %v2605_v0 }
 0x1ce   : > { %v861_v63 = vmax.f32 %v659_v61, 0.0 }
 0x1cf   : > { %v663_v1 = vpop.f32.mrf.mxu0 }
 0x1d0   : > { %v664_v2 = vadd.f32 %v2917_v37, %v663_v1  ;;  %1135 = vmatmul.mubr.f32.gmra.mxu1 %v861_v63 }
 0x1d1   : > { %v665_v3 = vpop.f32.mrf.mxu0  ;;  %1140 = vmatprep.mubr.f32.mxu1 %v2605_v0 }
 0x1d2   : > { %v862_v4 = vmax.f32 %v664_v2, 0.0 }
 0x1d3   : > { %v668_v5 = vpop.f32.mrf.mxu0 }
 0x1d4   : > { %v669_v6 = vadd.f32 %v2917_v37, %v668_v5  ;;  %1141 = vmatmul.mubr.f32.gmra.mxu1 %v862_v4 }
 0x1d5   : > { %v670_v7 = vpop.f32.mrf.mxu0  ;;  %1146 = vmatprep.mubr.f32.mxu1 %v2605_v0 }
 0x1d6   : > { %v863_v8 = vmax.f32 %v669_v6, 0.0 }
 0x1d7   : > { %v673_v9 = vpop.f32.mrf.mxu0 }
 0x1d8   : > { %v674_v10 = vadd.f32 %v2917_v37, %v673_v9  ;;  %1147 = vmatmul.mubr.f32.gmra.mxu1 %v863_v8 }
 0x1d9   : > { %v675_v11 = vpop.f32.mrf.mxu0  ;;  %1152 = vmatprep.mubr.f32.mxu1 %v2605_v0 }
 0x1da   : > { %v864_v12 = vmax.f32 %v674_v10, 0.0 }
 0x1db   : > { %v678_v13 = vpop.f32.mrf.mxu0 }
 0x1dc   : > { %v679_v14 = vadd.f32 %v2917_v37, %v678_v13  ;;  %1153 = vmatmul.mubr.f32.gmra.mxu1 %v864_v12 }
 0x1dd   : > { %v680_v15 = vpop.f32.mrf.mxu0  ;;  %1158 = vmatprep.mubr.f32.mxu1 %v2605_v0 }
 0x1de   : > { %v865_v16 = vmax.f32 %v679_v14, 0.0 }
 0x1df   : > { %v683_v17 = vpop.f32.mrf.mxu0 }
 0x1e0   : > { %v684_v18 = vadd.f32 %v2917_v37, %v683_v17  ;;  %1159 = vmatmul.mubr.f32.gmra.mxu1 %v865_v16 }
 0x1e1   : > { %v685_v19 = vpop.f32.mrf.mxu0  ;;  %1164 = vmatprep.mubr.f32.mxu1 %v2605_v0 }
 0x1e2   : > { %v866_v20 = vmax.f32 %v684_v18, 0.0 }
 0x1e3   : > { %v688_v21 = vpop.f32.mrf.mxu0 }
 0x1e4   : > { %v689_v22 = vadd.f32 %v2917_v37, %v688_v21  ;;  %1165 = vmatmul.mubr.f32.gmra.mxu1 %v866_v20 }
 0x1e5   : > { %v690_v23 = vpop.f32.mrf.mxu0  ;;  %1170 = vmatprep.mubr.f32.mxu1 %v2605_v0 }
 0x1e6   : > { %v867_v24 = vmax.f32 %v689_v22, 0.0 }
 0x1e7   : > { %v693_v25 = vpop.f32.mrf.mxu0 }
 0x1e8   : > { %v694_v26 = vadd.f32 %v2917_v37, %v693_v25  ;;  %1171 = vmatmul.mubr.f32.gmra.mxu1 %v867_v24 }
 0x1e9   : > { %v695_v27 = vpop.f32.mrf.mxu0  ;;  %1176 = vmatprep.mubr.f32.mxu1 %v2605_v0 }
 0x1ea   : > { %v868_v28 = vmax.f32 %v694_v26, 0.0 }
 0x1eb   : > { %v698_v29 = vpop.f32.mrf.mxu0 }
 0x1ec   : > { %v699_v30 = vadd.f32 %v2917_v37, %v698_v29  ;;  %1177 = vmatmul.mubr.f32.gmra.mxu1 %v868_v28 }
 0x1ed   : > { %v700_v31 = vpop.f32.mrf.mxu0  ;;  %1182 = vmatprep.mubr.f32.mxu1 %v2605_v0 }
 0x1ee   : > { %v869_v32 = vmax.f32 %v699_v30, 0.0 }
 0x1ef   : > { %v703_v33 = vpop.f32.mrf.mxu0 }
 0x1f0   : > { %v704_v34 = vadd.f32 %v2917_v37, %v703_v33  ;;  %1183 = vmatmul.mubr.f32.gmra.mxu1 %v869_v32 }
 0x1f1   : > { %v705_v35 = vpop.f32.mrf.mxu0  ;;  %1188 = vmatprep.mubr.f32.mxu1 %v2605_v0 }
 0x1f2   : > { %v870_v36 = vmax.f32 %v704_v34, 0.0 }
 0x1f3   : > { %v708_v38 = vpop.f32.mrf.mxu0 }
 0x1f4   : > { %v709_v39 = vadd.f32 %v2917_v37, %v708_v38  ;;  %1189 = vmatmul.mubr.f32.gmra.mxu1 %v870_v36 }
 0x1f5   : > { %v710_v40 = vpop.f32.mrf.mxu0  ;;  %1194 = vmatprep.mubr.f32.mxu1 %v2605_v0 }
 0x1f6   : > { %v871_v41 = vmax.f32 %v709_v39, 0.0 }
 0x1f7   : > { %v713_v42 = vpop.f32.mrf.mxu0 }
 0x1f8   : > { %v714_v43 = vadd.f32 %v2917_v37, %v713_v42  ;;  %1195 = vmatmul.mubr.f32.gmra.mxu1 %v871_v41 }
 0x1f9   : > { %v715_v44 = vpop.f32.mrf.mxu0  ;;  %1200 = vmatprep.mubr.f32.mxu1 %v2605_v0 }
 0x1fa   : > { %v872_v45 = vmax.f32 %v714_v43, 0.0 }
 0x1fb   : > { %v718_v46 = vpop.f32.mrf.mxu0 }
 0x1fc   : > { %v719_v47 = vadd.f32 %v2917_v37, %v718_v46  ;;  %1201 = vmatmul.mubr.f32.gmra.mxu1 %v872_v45 }
 0x1fd   : > { %v720_v48 = vpop.f32.mrf.mxu0  ;;  %1206 = vmatprep.mubr.f32.mxu1 %v2605_v0 }
 0x1fe   : > { %v873_v49 = vmax.f32 %v719_v47, 0.0 }
 0x1ff   : > { %v723_v50 = vpop.f32.mrf.mxu0 }
 0x200   : > { %v724_v51 = vadd.f32 %v2917_v37, %v723_v50  ;;  %1207 = vmatmul.mubr.f32.gmra.mxu1 %v873_v49 }
 0x201   : > { %v725_v52 = vpop.f32.mrf.mxu0  ;;  %1212 = vmatprep.mubr.f32.mxu1 %v2605_v0 }
 0x202   : > { %v874_v53 = vmax.f32 %v724_v51, 0.0 }
 0x203   : > { %v728_v54 = vpop.f32.mrf.mxu0 }
 0x204   : > { %v729_v55 = vadd.f32 %v2917_v37, %v728_v54  ;;  %1213 = vmatmul.mubr.f32.gmra.mxu1 %v874_v53 }
 0x205   : > { %v730_v56 = vpop.f32.mrf.mxu0  ;;  %1218 = vmatprep.mubr.f32.mxu1 %v2605_v0 }
 0x206   : > { %v875_v57 = vmax.f32 %v729_v55, 0.0 }
 0x207   : > { %v733_v58 = vpop.f32.mrf.mxu0 }
 0x208   : > { %v734_v59 = vadd.f32 %v2917_v37, %v733_v58  ;;  %1219 = vmatmul.mubr.f32.gmra.mxu1 %v875_v57 }
 0x209   : > { %v735_v60 = vpop.f32.mrf.mxu0  ;;  %1224 = vmatprep.mubr.f32.mxu1 %v2605_v0 }
 0x20a   : > { %v876_v61 = vmax.f32 %v734_v59, 0.0 }
 0x20b   : > { %v738_v62 = vpop.f32.mrf.mxu0 }
 0x20c   : > { %v739_v63 = vadd.f32 %v2917_v37, %v738_v62  ;;  %1225 = vmatmul.mubr.f32.gmra.mxu1 %v876_v61 }
 0x20d   : > { %v740_v1 = vpop.f32.mrf.mxu0  ;;  %1230 = vmatprep.mubr.f32.mxu1 %v2605_v0 }
 0x20e   : > { %v877_v2 = vmax.f32 %v739_v63, 0.0 }
 0x20f   : > { %v743_v3 = vpop.f32.mrf.mxu0 }
 0x210   : > { %v744_v4 = vadd.f32 %v2917_v37, %v743_v3  ;;  %1231 = vmatmul.mubr.f32.gmra.mxu1 %v877_v2 }
 0x211   : > { %v745_v5 = vpop.f32.mrf.mxu0  ;;  %1236 = vmatprep.mubr.f32.mxu1 %v2605_v0 }
 0x212   : > { %v878_v6 = vmax.f32 %v744_v4, 0.0 }
 0x213   : > { %v748_v7 = vpop.f32.mrf.mxu0 }
 0x214   : > { %v749_v8 = vadd.f32 %v2917_v37, %v748_v7  ;;  %1237 = vmatmul.mubr.f32.gmra.mxu1 %v878_v6 }
 0x215   : > { %v750_v9 = vpop.f32.mrf.mxu0  ;;  %1242 = vmatprep.mubr.f32.mxu1 %v2605_v0 }
 0x216   : > { %v879_v10 = vmax.f32 %v749_v8, 0.0 }
 0x217   : > { %v753_v11 = vpop.f32.mrf.mxu0 }
 0x218   : > { %v754_v12 = vadd.f32 %v2917_v37, %v753_v11  ;;  %1243 = vmatmul.mubr.f32.gmra.mxu1 %v879_v10 }
 0x219   : > { %v755_v13 = vpop.f32.mrf.mxu0  ;;  %1248 = vmatprep.mubr.f32.mxu1 %v2605_v0 }
 0x21a   : > { %v880_v14 = vmax.f32 %v754_v12, 0.0 }
 0x21b   : > { %v758_v15 = vpop.f32.mrf.mxu0 }
 0x21c   : > { %v759_v16 = vadd.f32 %v2917_v37, %v758_v15  ;;  %v962_v17 = vpop.f32.mrf.mxu1  ;;  %1249 = vmatmul.mubr.f32.gmra.mxu1 %v880_v14 }
 0x21d   : > { %v1345_v18 = vmul.f32 0.5, %v962_v17  ;;  %v760_v19 = vpop.f32.mrf.mxu0  ;;  %1254 = vmatprep.mubr.f32.mxu1 %v2605_v0 }
 0x21e   : > { %v881_v20 = vmax.f32 %v759_v16, 0.0  ;;  %v964_v21 = vpop.f32.mrf.mxu1 }
 0x21f   : > { %2191 = vtanh.f32 %v1345_v18  ;;  %v1346_v22 = vmul.f32 0.5, %v964_v21  ;;  %v763_v23 = vpop.f32.mrf.mxu0 }
 0x220   : > { %v764_v24 = vadd.f32 %v2917_v37, %v763_v23  ;;  %v968_v25 = vpop.f32.mrf.mxu1  ;;  %1255 = vmatmul.mubr.f32.gmra.mxu1 %v881_v20 }
 0x221   : > { %2193 = vtanh.f32 %v1346_v22  ;;  %v1347_v26 = vmul.f32 0.5, %v968_v25  ;;  %v765_v27 = vpop.f32.mrf.mxu0  ;;  %1260 = vmatprep.mubr.f32.mxu1 %v2605_v0 }
 0x222   : > { %v882_v28 = vmax.f32 %v764_v24, 0.0  ;;  %v970_v29 = vpop.f32.mrf.mxu1 }
 0x223   : > { %2195 = vtanh.f32 %v1347_v26  ;;  %v1348_v30 = vmul.f32 0.5, %v970_v29  ;;  %v768_v31 = vpop.f32.mrf.mxu0 }
 0x224   : > { %v769_v32 = vadd.f32 %v2917_v37, %v768_v31  ;;  %v974_v33 = vpop.f32.mrf.mxu1  ;;  %1261 = vmatmul.mubr.f32.gmra.mxu1 %v882_v28 }
 0x225   : > { %2197 = vtanh.f32 %v1348_v30  ;;  %v1349_v34 = vmul.f32 0.5, %v974_v33  ;;  %v770_v35 = vpop.f32.mrf.mxu0  ;;  %1266 = vmatprep.mubr.f32.mxu1 %v2605_v0 }
 0x226   : > { %v883_v36 = vmax.f32 %v769_v32, 0.0  ;;  %v976_v38 = vpop.f32.mrf.mxu1 }
 0x227   : > { %2199 = vtanh.f32 %v1349_v34  ;;  %v1350_v39 = vmul.f32 0.5, %v976_v38  ;;  %v773_v40 = vpop.f32.mrf.mxu0 }
 0x228   : > { %v774_v41 = vadd.f32 %v2917_v37, %v773_v40  ;;  %v980_v42 = vpop.f32.mrf.mxu1  ;;  %1267 = vmatmul.mubr.f32.gmra.mxu1 %v883_v36 }
 0x229   : > { %2201 = vtanh.f32 %v1350_v39  ;;  %v1351_v43 = vmul.f32 0.5, %v980_v42  ;;  %v775_v44 = vpop.f32.mrf.mxu0  ;;  %1272 = vmatprep.mubr.f32.mxu1 %v2605_v0 }
 0x22a   : > { %v884_v45 = vmax.f32 %v774_v41, 0.0  ;;  %v982_v46 = vpop.f32.mrf.mxu1 }
 0x22b   : > { %2203 = vtanh.f32 %v1351_v43  ;;  %v1352_v47 = vmul.f32 0.5, %v982_v46  ;;  %v778_v48 = vpop.f32.mrf.mxu0 }
 0x22c   : > { %v2192_v49 = vpop.eup %2191  ;;  %v779_v50 = vadd.f32 %v2917_v37, %v778_v48  ;;  %v986_v51 = vpop.f32.mrf.mxu1  ;;  %1273 = vmatmul.mubr.f32.gmra.mxu1 %v884_v45 }
 0x22d   : > { %v1601_v52 = vmul.f32 0.5, %v2192_v49  ;;  %2205 = vtanh.f32 %v1352_v47  ;;  %v1353_v53 = vmul.f32 0.5, %v986_v51  ;;  %v780_v54 = vpop.f32.mrf.mxu0  ;;  %1278 = vmatprep.mubr.f32.mxu1 %v2605_v0 }
 0x22e   : > { %v2194_v55 = vpop.eup %2193  ;;  %v885_v56 = vmax.f32 %v779_v50, 0.0  ;;  %v988_v57 = vpop.f32.mrf.mxu1 }
 0x22f   : > { %v1729_v58 = vadd.f32 0.5, %v1601_v52  ;;  %v1602_v59 = vmul.f32 0.5, %v2194_v55  ;;  %2207 = vtanh.f32 %v1353_v53  ;;  %v1354_v60 = vmul.f32 0.5, %v988_v57  ;;  %v783_v61 = vpop.f32.mrf.mxu0 }
 0x230   : > { %v2196_v62 = vpop.eup %2195  ;;  %v784_v63 = vadd.f32 %v2917_v37, %v783_v61  ;;  %v992_v1 = vpop.f32.mrf.mxu1  ;;  %1279 = vmatmul.mubr.f32.gmra.mxu1 %v885_v56 }
 0x231   : > { %1857 = vst [vmem:[%s3059_s9] sm:$0xff] %v1729_v58  ;;  %v1730_v2 = vadd.f32 0.5, %v1602_v59  ;;  %v1603_v3 = vmul.f32 0.5, %v2196_v62  ;;  %2209 = vtanh.f32 %v1354_v60  ;;  %v1355_v4 = vmul.f32 0.5, %v992_v1  ;;  %v785_v5 = vpop.f32.mrf.mxu0  ;;  %1284 = vmatprep.mubr.f32.mxu1 %v2605_v0 }
 0x232   : > { %v2198_v6 = vpop.eup %2197  ;;  %v886_v7 = vmax.f32 %v784_v63, 0.0  ;;  %v994_v8 = vpop.f32.mrf.mxu1 }
 0x233   : > { %1858 = vst [vmem:[%s3059_s9 + $0x8] sm:$0xff] %v1730_v2  ;;  %v1731_v9 = vadd.f32 0.5, %v1603_v3  ;;  %v1604_v10 = vmul.f32 0.5, %v2198_v6  ;;  %2211 = vtanh.f32 %v1355_v4  ;;  %v1356_v11 = vmul.f32 0.5, %v994_v8  ;;  %v788_v12 = vpop.f32.mrf.mxu0 }
 0x234   : > { %v2200_v13 = vpop.eup %2199  ;;  %v789_v14 = vadd.f32 %v2917_v37, %v788_v12  ;;  %v998_v15 = vpop.f32.mrf.mxu1  ;;  %1285 = vmatmul.mubr.f32.gmra.mxu1 %v886_v7  ;;  %v3083_v7 = vld [vmem:[%s3266_s3] ss:$0 sm:$0xff] }
 0x235   : > { %1859 = vst [vmem:[%s3059_s9 + $0x10] sm:$0xff] %v1731_v9  ;;  %v1732_v16 = vadd.f32 0.5, %v1604_v10  ;;  %v1605_v17 = vmul.f32 0.5, %v2200_v13  ;;  %2213 = vtanh.f32 %v1356_v11  ;;  %v1357_v18 = vmul.f32 0.5, %v998_v15  ;;  %v790_v19 = vpop.f32.mrf.mxu0  ;;  %1290 = vmatprep.mubr.f32.mxu1 %v2605_v0 }
 0x236   : > { %v2202_v20 = vpop.eup %2201  ;;  %v887_v21 = vmax.f32 %v789_v14, 0.0  ;;  %v1000_v22 = vpop.f32.mrf.mxu1 }
 0x237   : > { %1860 = vst [vmem:[%s3059_s9 + $0x18] sm:$0xff] %v1732_v16  ;;  %v1733_v23 = vadd.f32 0.5, %v1605_v17  ;;  %v1606_v24 = vmul.f32 0.5, %v2202_v20  ;;  %2215 = vtanh.f32 %v1357_v18  ;;  %v1358_v25 = vmul.f32 0.5, %v1000_v22  ;;  %v793_v26 = vpop.f32.mrf.mxu0 }
 0x238   : > { %v2204_v27 = vpop.eup %2203  ;;  %v794_v28 = vadd.f32 %v2917_v37, %v793_v26  ;;  %v1004_v29 = vpop.f32.mrf.mxu1  ;;  %1291 = vmatmul.mubr.f32.gmra.mxu1 %v887_v21 }
 0x239   : > { %1861 = vst [vmem:[%s3059_s9 + $0x20] sm:$0xff] %v1733_v23  ;;  %v1734_v30 = vadd.f32 0.5, %v1606_v24  ;;  %v1607_v31 = vmul.f32 0.5, %v2204_v27  ;;  %2217 = vtanh.f32 %v1358_v25  ;;  %v1359_v32 = vmul.f32 0.5, %v1004_v29  ;;  %v795_v33 = vpop.f32.mrf.mxu0  ;;  %1296 = vmatprep.mubr.f32.mxu1 %v2605_v0 }
 0x23a   : > { %v2206_v34 = vpop.eup %2205  ;;  %v888_v35 = vmax.f32 %v794_v28, 0.0  ;;  %v1006_v36 = vpop.f32.mrf.mxu1 }
 0x23b   : > { %1862 = vst [vmem:[%s3059_s9 + $0x28] sm:$0xff] %v1734_v30  ;;  %v1735_v38 = vadd.f32 0.5, %v1607_v31  ;;  %v1608_v39 = vmul.f32 0.5, %v2206_v34  ;;  %2219 = vtanh.f32 %v1359_v32  ;;  %v1360_v40 = vmul.f32 0.5, %v1006_v36  ;;  %v798_v41 = vpop.f32.mrf.mxu0 }
 0x23c   : > { %v2208_v42 = vpop.eup %2207  ;;  %v799_v43 = vadd.f32 %v2917_v37, %v798_v41  ;;  %v1010_v44 = vpop.f32.mrf.mxu1  ;;  %1297 = vmatmul.mubr.f32.gmra.mxu1 %v888_v35 }
 0x23d   : > { %1863 = vst [vmem:[%s3059_s9 + $0x30] sm:$0xff] %v1735_v38  ;;  %v1736_v45 = vadd.f32 0.5, %v1608_v39  ;;  %v1609_v46 = vmul.f32 0.5, %v2208_v42  ;;  %2221 = vtanh.f32 %v1360_v40  ;;  %v1361_v47 = vmul.f32 0.5, %v1010_v44  ;;  %v800_v48 = vpop.f32.mrf.mxu0  ;;  %1302 = vmatprep.mubr.f32.mxu1 %v2605_v0 }
 0x23e   : > { %v2210_v49 = vpop.eup %2209  ;;  %v889_v50 = vmax.f32 %v799_v43, 0.0  ;;  %v1012_v51 = vpop.f32.mrf.mxu1 }
 0x23f   : > { %1864 = vst [vmem:[%s3059_s9 + $0x38] sm:$0xff] %v1736_v45  ;;  %v1737_v52 = vadd.f32 0.5, %v1609_v46  ;;  %v1610_v53 = vmul.f32 0.5, %v2210_v49  ;;  %2223 = vtanh.f32 %v1361_v47  ;;  %v1362_v54 = vmul.f32 0.5, %v1012_v51  ;;  %v803_v55 = vpop.f32.mrf.mxu0 }
 0x240   : > { %v2212_v56 = vpop.eup %2211  ;;  %v804_v57 = vadd.f32 %v2917_v37, %v803_v55  ;;  %v1016_v58 = vpop.f32.mrf.mxu1  ;;  %1303 = vmatmul.mubr.f32.gmra.mxu1 %v889_v50 }
 0x241   : > { %1865 = vst [vmem:[%s3059_s9 + $0x40] sm:$0xff] %v1737_v52  ;;  %v1738_v59 = vadd.f32 0.5, %v1610_v53  ;;  %v1611_v60 = vmul.f32 0.5, %v2212_v56  ;;  %2225 = vtanh.f32 %v1362_v54  ;;  %v1363_v61 = vmul.f32 0.5, %v1016_v58  ;;  %v805_v62 = vpop.f32.mrf.mxu0  ;;  %1308 = vmatprep.mubr.f32.mxu1 %v2605_v0 }
 0x242   : > { %v2214_v63 = vpop.eup %2213  ;;  %v890_v1 = vmax.f32 %v804_v57, 0.0  ;;  %v1018_v2 = vpop.f32.mrf.mxu1 }
 0x243   : > { %1866 = vst [vmem:[%s3059_s9 + $0x48] sm:$0xff] %v1738_v59  ;;  %v1739_v3 = vadd.f32 0.5, %v1611_v60  ;;  %v1612_v4 = vmul.f32 0.5, %v2214_v63  ;;  %2227 = vtanh.f32 %v1363_v61  ;;  %v1364_v5 = vmul.f32 0.5, %v1018_v2  ;;  %v808_v37 = vpop.f32.mrf.mxu0 }
 0x244   : > { %v2216_v6 = vpop.eup %2215  ;;  %v809_v8 = vadd.f32 %v3083_v7, %v808_v37  ;;  %v1022_v9 = vpop.f32.mrf.mxu1  ;;  %1309 = vmatmul.mubr.f32.gmra.mxu1 %v890_v1 }
 0x245   : > { %1867 = vst [vmem:[%s3059_s9 + $0x50] sm:$0xff] %v1739_v3  ;;  %v1740_v10 = vadd.f32 0.5, %v1612_v4  ;;  %v1613_v11 = vmul.f32 0.5, %v2216_v6  ;;  %2229 = vtanh.f32 %v1364_v5  ;;  %v1365_v12 = vmul.f32 0.5, %v1022_v9  ;;  %v810_v13 = vpop.f32.mrf.mxu0  ;;  %1314 = vmatprep.mubr.f32.mxu1 %v2605_v0 }
 0x246   : > { %v2218_v14 = vpop.eup %2217  ;;  %v891_v15 = vmax.f32 %v809_v8, 0.0  ;;  %v1024_v16 = vpop.f32.mrf.mxu1 }
 0x247   : > { %1868 = vst [vmem:[%s3059_s9 + $0x58] sm:$0xff] %v1740_v10  ;;  %v1741_v17 = vadd.f32 0.5, %v1613_v11  ;;  %v1614_v18 = vmul.f32 0.5, %v2218_v14  ;;  %2231 = vtanh.f32 %v1365_v12  ;;  %v1366_v19 = vmul.f32 0.5, %v1024_v16  ;;  %v813_v20 = vpop.f32.mrf.mxu0 }
 0x248   : > { %v2220_v21 = vpop.eup %2219  ;;  %v814_v22 = vadd.f32 %v3083_v7, %v813_v20  ;;  %v1028_v23 = vpop.f32.mrf.mxu1  ;;  %1315 = vmatmul.mubr.f32.gmra.mxu1 %v891_v15 }
 0x249   : > { %1869 = vst [vmem:[%s3059_s9 + $0x60] sm:$0xff] %v1741_v17  ;;  %v1742_v24 = vadd.f32 0.5, %v1614_v18  ;;  %v1615_v25 = vmul.f32 0.5, %v2220_v21  ;;  %2233 = vtanh.f32 %v1366_v19  ;;  %v1367_v26 = vmul.f32 0.5, %v1028_v23  ;;  %v815_v27 = vpop.f32.mrf.mxu0  ;;  %1320 = vmatprep.mubr.f32.mxu1 %v2605_v0 }
 0x24a   : > { %v2222_v28 = vpop.eup %2221  ;;  %v892_v29 = vmax.f32 %v814_v22, 0.0  ;;  %v1030_v30 = vpop.f32.mrf.mxu1 }
 0x24b   : > { %1870 = vst [vmem:[%s3059_s9 + $0x68] sm:$0xff] %v1742_v24  ;;  %v1743_v31 = vadd.f32 0.5, %v1615_v25  ;;  %v1616_v32 = vmul.f32 0.5, %v2222_v28  ;;  %2235 = vtanh.f32 %v1367_v26  ;;  %v1368_v33 = vmul.f32 0.5, %v1030_v30  ;;  %v818_v34 = vpop.f32.mrf.mxu0 }
 0x24c   : > { %v2224_v35 = vpop.eup %2223  ;;  %v819_v36 = vadd.f32 %v3083_v7, %v818_v34  ;;  %v1034_v38 = vpop.f32.mrf.mxu1  ;;  %1321 = vmatmul.mubr.f32.gmra.mxu1 %v892_v29 }
 0x24d   : > { %1871 = vst [vmem:[%s3059_s9 + $0x70] sm:$0xff] %v1743_v31  ;;  %v1744_v39 = vadd.f32 0.5, %v1616_v32  ;;  %v1617_v40 = vmul.f32 0.5, %v2224_v35  ;;  %2237 = vtanh.f32 %v1368_v33  ;;  %v1369_v41 = vmul.f32 0.5, %v1034_v38  ;;  %v820_v42 = vpop.f32.mrf.mxu0  ;;  %1326 = vmatprep.mubr.f32.mxu1 %v2605_v0 }
 0x24e   : > { %v2226_v43 = vpop.eup %2225  ;;  %v893_v44 = vmax.f32 %v819_v36, 0.0  ;;  %v1036_v45 = vpop.f32.mrf.mxu1 }
 0x24f   : > { %1872 = vst [vmem:[%s3059_s9 + $0x78] sm:$0xff] %v1744_v39  ;;  %v1745_v46 = vadd.f32 0.5, %v1617_v40  ;;  %v1618_v47 = vmul.f32 0.5, %v2226_v43  ;;  %2239 = vtanh.f32 %v1369_v41  ;;  %v1370_v48 = vmul.f32 0.5, %v1036_v45  ;;  %v823_v49 = vpop.f32.mrf.mxu0 }
 0x250   : > { %v2228_v50 = vpop.eup %2227  ;;  %v824_v51 = vadd.f32 %v3083_v7, %v823_v49  ;;  %v1040_v52 = vpop.f32.mrf.mxu1  ;;  %1327 = vmatmul.mubr.f32.gmra.mxu1 %v893_v44 }
 0x251   : > { %1873 = vst [vmem:[%s3059_s9 + $0x80] sm:$0xff] %v1745_v46  ;;  %v1746_v53 = vadd.f32 0.5, %v1618_v47  ;;  %v1619_v54 = vmul.f32 0.5, %v2228_v50  ;;  %2241 = vtanh.f32 %v1370_v48  ;;  %v1371_v55 = vmul.f32 0.5, %v1040_v52  ;;  %v825_v56 = vpop.f32.mrf.mxu0  ;;  %1332 = vmatprep.mubr.f32.mxu1 %v2605_v0 }
 0x252   : > { %v2230_v57 = vpop.eup %2229  ;;  %v894_v58 = vmax.f32 %v824_v51, 0.0  ;;  %v1042_v59 = vpop.f32.mrf.mxu1 }
 0x253   : > { %1874 = vst [vmem:[%s3059_s9 + $0x88] sm:$0xff] %v1746_v53  ;;  %v1747_v60 = vadd.f32 0.5, %v1619_v54  ;;  %v1620_v61 = vmul.f32 0.5, %v2230_v57  ;;  %2243 = vtanh.f32 %v1371_v55  ;;  %v1372_v62 = vmul.f32 0.5, %v1042_v59  ;;  %v828_v63 = vpop.f32.mrf.mxu0 }
 0x254   : > { %v2232_v1 = vpop.eup %2231  ;;  %v829_v2 = vadd.f32 %v3083_v7, %v828_v63  ;;  %v1046_v3 = vpop.f32.mrf.mxu1  ;;  %1333 = vmatmul.mubr.f32.gmra.mxu1 %v894_v58 }
 0x255   : > { %1875 = vst [vmem:[%s3059_s9 + $0x90] sm:$0xff] %v1747_v60  ;;  %v1748_v4 = vadd.f32 0.5, %v1620_v61  ;;  %v1621_v5 = vmul.f32 0.5, %v2232_v1  ;;  %2245 = vtanh.f32 %v1372_v62  ;;  %v1373_v37 = vmul.f32 0.5, %v1046_v3  ;;  %v830_v6 = vpop.f32.mrf.mxu0  ;;  %1338 = vmatprep.mubr.f32.mxu1 %v2605_v0 }
 0x256   : > { %v2234_v8 = vpop.eup %2233  ;;  %v895_v9 = vmax.f32 %v829_v2, 0.0  ;;  %v1048_v10 = vpop.f32.mrf.mxu1 }
 0x257   : > { %1876 = vst [vmem:[%s3059_s9 + $0x98] sm:$0xff] %v1748_v4  ;;  %v1749_v11 = vadd.f32 0.5, %v1621_v5  ;;  %v1622_v12 = vmul.f32 0.5, %v2234_v8  ;;  %2247 = vtanh.f32 %v1373_v37  ;;  %v1374_v7 = vmul.f32 0.5, %v1048_v10 }
 0x258   : > { %v2236_v13 = vpop.eup %2235  ;;  %v1052_v14 = vpop.f32.mrf.mxu1  ;;  %1339 = vmatmul.mubr.f32.gmra.mxu1 %v895_v9 }
 0x259   : > { %1877 = vst [vmem:[%s3059_s9 + $0xa0] sm:$0xff] %v1749_v11  ;;  %v1750_v15 = vadd.f32 0.5, %v1622_v12  ;;  %v1623_v16 = vmul.f32 0.5, %v2236_v13  ;;  %2249 = vtanh.f32 %v1374_v7  ;;  %v1375_v17 = vmul.f32 0.5, %v1052_v14 }
 0x25a   : > { %v2238_v18 = vpop.eup %2237  ;;  %v1054_v0 = vpop.f32.mrf.mxu1 }
 0x25b   : > { %1878 = vst [vmem:[%s3059_s9 + $0xa8] sm:$0xff] %v1750_v15  ;;  %v1751_v19 = vadd.f32 0.5, %v1623_v16  ;;  %v1624_v20 = vmul.f32 0.5, %v2238_v18  ;;  %2251 = vtanh.f32 %v1375_v17  ;;  %v1376_v21 = vmul.f32 0.5, %v1054_v0 }
 0x25c   : > { %v2240_v22 = vpop.eup %2239  ;;  %v1058_v23 = vpop.f32.mrf.mxu1 }
 0x25d   : > { %1879 = vst [vmem:[%s3059_s9 + $0xb0] sm:$0xff] %v1751_v19  ;;  %v1752_v24 = vadd.f32 0.5, %v1624_v20  ;;  %v1625_v25 = vmul.f32 0.5, %v2240_v22  ;;  %2253 = vtanh.f32 %v1376_v21  ;;  %v1377_v26 = vmul.f32 0.5, %v1058_v23 }
 0x25e   : > { %v2242_v27 = vpop.eup %2241  ;;  %v1060_v28 = vpop.f32.mrf.mxu1 }
 0x25f   : > { %1880 = vst [vmem:[%s3059_s9 + $0xb8] sm:$0xff] %v1752_v24  ;;  %v1753_v29 = vadd.f32 0.5, %v1625_v25  ;;  %v1626_v30 = vmul.f32 0.5, %v2242_v27  ;;  %2255 = vtanh.f32 %v1377_v26  ;;  %v1378_v31 = vmul.f32 0.5, %v1060_v28 }
 0x260   : > { %v2244_v32 = vpop.eup %2243  ;;  %v1064_v33 = vpop.f32.mrf.mxu1 }
 0x261   : > { %1881 = vst [vmem:[%s3059_s9 + $0xc0] sm:$0xff] %v1753_v29  ;;  %v1754_v34 = vadd.f32 0.5, %v1626_v30  ;;  %v1627_v35 = vmul.f32 0.5, %v2244_v32  ;;  %2257 = vtanh.f32 %v1378_v31  ;;  %v1379_v36 = vmul.f32 0.5, %v1064_v33 }
 0x262   : > { %v2246_v38 = vpop.eup %2245  ;;  %v1066_v39 = vpop.f32.mrf.mxu1 }
 0x263   : > { %1882 = vst [vmem:[%s3059_s9 + $0xc8] sm:$0xff] %v1754_v34  ;;  %v1755_v40 = vadd.f32 0.5, %v1627_v35  ;;  %v1628_v41 = vmul.f32 0.5, %v2246_v38  ;;  %2259 = vtanh.f32 %v1379_v36  ;;  %v1380_v42 = vmul.f32 0.5, %v1066_v39 }
 0x264   : > { %v2248_v43 = vpop.eup %2247  ;;  %v1070_v44 = vpop.f32.mrf.mxu1 }
 0x265   : > { %1883 = vst [vmem:[%s3059_s9 + $0xd0] sm:$0xff] %v1755_v40  ;;  %v1756_v45 = vadd.f32 0.5, %v1628_v41  ;;  %v1629_v46 = vmul.f32 0.5, %v2248_v43  ;;  %2261 = vtanh.f32 %v1380_v42  ;;  %v1381_v47 = vmul.f32 0.5, %v1070_v44 }
 0x266   : > { %v2250_v48 = vpop.eup %2249  ;;  %v1072_v49 = vpop.f32.mrf.mxu1 }
 0x267   : > { %1884 = vst [vmem:[%s3059_s9 + $0xd8] sm:$0xff] %v1756_v45  ;;  %v1757_v50 = vadd.f32 0.5, %v1629_v46  ;;  %v1630_v51 = vmul.f32 0.5, %v2250_v48  ;;  %2263 = vtanh.f32 %v1381_v47  ;;  %v1382_v52 = vmul.f32 0.5, %v1072_v49 }
 0x268   : > { %v2252_v53 = vpop.eup %2251  ;;  %v1076_v54 = vpop.f32.mrf.mxu1 }
 0x269   : > { %1885 = vst [vmem:[%s3059_s9 + $0xe0] sm:$0xff] %v1757_v50  ;;  %v1758_v55 = vadd.f32 0.5, %v1630_v51  ;;  %v1631_v56 = vmul.f32 0.5, %v2252_v53  ;;  %2265 = vtanh.f32 %v1382_v52  ;;  %v1383_v57 = vmul.f32 0.5, %v1076_v54 }
 0x26a   : > { %v2254_v58 = vpop.eup %2253  ;;  %v1078_v59 = vpop.f32.mrf.mxu1 }
 0x26b   : > { %1886 = vst [vmem:[%s3059_s9 + $0xe8] sm:$0xff] %v1758_v55  ;;  %v1759_v60 = vadd.f32 0.5, %v1631_v56  ;;  %v1632_v61 = vmul.f32 0.5, %v2254_v58  ;;  %2267 = vtanh.f32 %v1383_v57  ;;  %v1384_v62 = vmul.f32 0.5, %v1078_v59 }
 0x26c   : > { %v2256_v63 = vpop.eup %2255  ;;  %v1082_v1 = vpop.f32.mrf.mxu1 }
 0x26d   : > { %1887 = vst [vmem:[%s3059_s9 + $0xf0] sm:$0xff] %v1759_v60  ;;  %v1760_v2 = vadd.f32 0.5, %v1632_v61  ;;  %v1633_v3 = vmul.f32 0.5, %v2256_v63  ;;  %2269 = vtanh.f32 %v1384_v62  ;;  %v1385_v4 = vmul.f32 0.5, %v1082_v1 }
 0x26e   : > { %v2258_v5 = vpop.eup %2257  ;;  %v1084_v37 = vpop.f32.mrf.mxu1 }
 0x26f   : > { %1888 = vst [vmem:[%s3059_s9 + $0xf8] sm:$0xff] %v1760_v2  ;;  %v1761_v6 = vadd.f32 0.5, %v1633_v3  ;;  %v1634_v8 = vmul.f32 0.5, %v2258_v5  ;;  %2271 = vtanh.f32 %v1385_v4  ;;  %v1386_v9 = vmul.f32 0.5, %v1084_v37 }
 0x270   : > { %v2260_v10 = vpop.eup %2259  ;;  %v1088_v11 = vpop.f32.mrf.mxu1 }
 0x271   : > { %1889 = vst [vmem:[%s3059_s9 + $0x100] sm:$0xff] %v1761_v6  ;;  %v1762_v12 = vadd.f32 0.5, %v1634_v8  ;;  %v1635_v7 = vmul.f32 0.5, %v2260_v10  ;;  %2273 = vtanh.f32 %v1386_v9  ;;  %v1387_v13 = vmul.f32 0.5, %v1088_v11 }
 0x272   : > { %v2262_v14 = vpop.eup %2261  ;;  %v1090_v15 = vpop.f32.mrf.mxu1 }
 0x273   : > { %1890 = vst [vmem:[%s3059_s9 + $0x108] sm:$0xff] %v1762_v12  ;;  %v1763_v16 = vadd.f32 0.5, %v1635_v7  ;;  %v1636_v17 = vmul.f32 0.5, %v2262_v14  ;;  %2275 = vtanh.f32 %v1387_v13  ;;  %v1388_v18 = vmul.f32 0.5, %v1090_v15 }
 0x274   : > { %v2264_v0 = vpop.eup %2263  ;;  %v1094_v19 = vpop.f32.mrf.mxu1 }
 0x275   : > { %1891 = vst [vmem:[%s3059_s9 + $0x110] sm:$0xff] %v1763_v16  ;;  %v1764_v20 = vadd.f32 0.5, %v1636_v17  ;;  %v1637_v21 = vmul.f32 0.5, %v2264_v0  ;;  %2277 = vtanh.f32 %v1388_v18  ;;  %v1389_v22 = vmul.f32 0.5, %v1094_v19 }
 0x276   : > { %v2266_v23 = vpop.eup %2265  ;;  %v1096_v24 = vpop.f32.mrf.mxu1 }
 0x277   : > { %1892 = vst [vmem:[%s3059_s9 + $0x118] sm:$0xff] %v1764_v20  ;;  %v1765_v25 = vadd.f32 0.5, %v1637_v21  ;;  %v1638_v26 = vmul.f32 0.5, %v2266_v23  ;;  %2279 = vtanh.f32 %v1389_v22  ;;  %v1390_v27 = vmul.f32 0.5, %v1096_v24 }
 0x278   : > { %v2268_v28 = vpop.eup %2267  ;;  %v1100_v29 = vpop.f32.mrf.mxu1 }
 0x279   : > { %1893 = vst [vmem:[%s3059_s9 + $0x120] sm:$0xff] %v1765_v25  ;;  %v1766_v30 = vadd.f32 0.5, %v1638_v26  ;;  %v1639_v31 = vmul.f32 0.5, %v2268_v28  ;;  %2281 = vtanh.f32 %v1390_v27  ;;  %v1391_v32 = vmul.f32 0.5, %v1100_v29 }
 0x27a   : > { %v2270_v33 = vpop.eup %2269  ;;  %v1102_v34 = vpop.f32.mrf.mxu1 }
 0x27b   : > { %1894 = vst [vmem:[%s3059_s9 + $0x128] sm:$0xff] %v1766_v30  ;;  %v1767_v35 = vadd.f32 0.5, %v1639_v31  ;;  %v1640_v36 = vmul.f32 0.5, %v2270_v33  ;;  %2283 = vtanh.f32 %v1391_v32  ;;  %v1392_v38 = vmul.f32 0.5, %v1102_v34 }
 0x27c   : > { %v2272_v39 = vpop.eup %2271  ;;  %v1106_v40 = vpop.f32.mrf.mxu1 }
 0x27d   : > { %1895 = vst [vmem:[%s3059_s9 + $0x130] sm:$0xff] %v1767_v35  ;;  %v1768_v41 = vadd.f32 0.5, %v1640_v36  ;;  %v1641_v42 = vmul.f32 0.5, %v2272_v39  ;;  %2285 = vtanh.f32 %v1392_v38  ;;  %v1393_v43 = vmul.f32 0.5, %v1106_v40 }
 0x27e   : > { %v2274_v44 = vpop.eup %2273  ;;  %v1108_v45 = vpop.f32.mrf.mxu1 }
 0x27f   : > { %1896 = vst [vmem:[%s3059_s9 + $0x138] sm:$0xff] %v1768_v41  ;;  %v1769_v46 = vadd.f32 0.5, %v1641_v42  ;;  %v1642_v47 = vmul.f32 0.5, %v2274_v44  ;;  %2287 = vtanh.f32 %v1393_v43  ;;  %v1394_v48 = vmul.f32 0.5, %v1108_v45 }
 0x280   : > { %v2276_v49 = vpop.eup %2275  ;;  %v1112_v50 = vpop.f32.mrf.mxu1 }
 0x281   : > { %1897 = vst [vmem:[%s3059_s9 + $0x140] sm:$0xff] %v1769_v46  ;;  %v1770_v51 = vadd.f32 0.5, %v1642_v47  ;;  %v1643_v52 = vmul.f32 0.5, %v2276_v49  ;;  %2289 = vtanh.f32 %v1394_v48  ;;  %v1395_v53 = vmul.f32 0.5, %v1112_v50 }
 0x282   : > { %v2278_v54 = vpop.eup %2277  ;;  %v1114_v55 = vpop.f32.mrf.mxu1 }
 0x283   : > { %1898 = vst [vmem:[%s3059_s9 + $0x148] sm:$0xff] %v1770_v51  ;;  %v1771_v56 = vadd.f32 0.5, %v1643_v52  ;;  %v1644_v57 = vmul.f32 0.5, %v2278_v54  ;;  %2291 = vtanh.f32 %v1395_v53  ;;  %v1396_v58 = vmul.f32 0.5, %v1114_v55 }
 0x284   : > { %v2280_v59 = vpop.eup %2279  ;;  %v1118_v60 = vpop.f32.mrf.mxu1 }
 0x285   : > { %1899 = vst [vmem:[%s3059_s9 + $0x150] sm:$0xff] %v1771_v56  ;;  %v1772_v61 = vadd.f32 0.5, %v1644_v57  ;;  %v1645_v62 = vmul.f32 0.5, %v2280_v59  ;;  %2293 = vtanh.f32 %v1396_v58  ;;  %v1397_v63 = vmul.f32 0.5, %v1118_v60 }
 0x286   : > { %v2282_v1 = vpop.eup %2281  ;;  %v1120_v2 = vpop.f32.mrf.mxu1 }
 0x287   : > { %1900 = vst [vmem:[%s3059_s9 + $0x158] sm:$0xff] %v1772_v61  ;;  %v1773_v3 = vadd.f32 0.5, %v1645_v62  ;;  %v1646_v4 = vmul.f32 0.5, %v2282_v1  ;;  %2295 = vtanh.f32 %v1397_v63  ;;  %v1398_v5 = vmul.f32 0.5, %v1120_v2 }
 0x288   : > { %v2284_v37 = vpop.eup %2283  ;;  %v1124_v6 = vpop.f32.mrf.mxu1 }
 0x289   : > { %1901 = vst [vmem:[%s3059_s9 + $0x160] sm:$0xff] %v1773_v3  ;;  %v1774_v8 = vadd.f32 0.5, %v1646_v4  ;;  %v1647_v9 = vmul.f32 0.5, %v2284_v37  ;;  %2297 = vtanh.f32 %v1398_v5  ;;  %v1399_v10 = vmul.f32 0.5, %v1124_v6 }
 0x28a   : > { %v2286_v11 = vpop.eup %2285  ;;  %v1126_v12 = vpop.f32.mrf.mxu1 }
 0x28b   : > { %1902 = vst [vmem:[%s3059_s9 + $0x168] sm:$0xff] %v1774_v8  ;;  %v1775_v7 = vadd.f32 0.5, %v1647_v9  ;;  %v1648_v13 = vmul.f32 0.5, %v2286_v11  ;;  %2299 = vtanh.f32 %v1399_v10  ;;  %v1400_v14 = vmul.f32 0.5, %v1126_v12 }
 0x28c   : > { %v2288_v15 = vpop.eup %2287  ;;  %v1130_v16 = vpop.f32.mrf.mxu1 }
 0x28d   : > { %1903 = vst [vmem:[%s3059_s9 + $0x170] sm:$0xff] %v1775_v7  ;;  %v1776_v17 = vadd.f32 0.5, %v1648_v13  ;;  %v1649_v18 = vmul.f32 0.5, %v2288_v15  ;;  %2301 = vtanh.f32 %v1400_v14  ;;  %v1401_v0 = vmul.f32 0.5, %v1130_v16 }
 0x28e   : > { %v2290_v19 = vpop.eup %2289  ;;  %v1132_v20 = vpop.f32.mrf.mxu1 }
 0x28f   : > { %1904 = vst [vmem:[%s3059_s9 + $0x178] sm:$0xff] %v1776_v17  ;;  %v1777_v21 = vadd.f32 0.5, %v1649_v18  ;;  %v1650_v22 = vmul.f32 0.5, %v2290_v19  ;;  %2303 = vtanh.f32 %v1401_v0  ;;  %v1402_v23 = vmul.f32 0.5, %v1132_v20 }
 0x290   : > { %v2292_v24 = vpop.eup %2291  ;;  %v1136_v25 = vpop.f32.mrf.mxu1 }
 0x291   : > { %1905 = vst [vmem:[%s3059_s9 + $0x180] sm:$0xff] %v1777_v21  ;;  %v1778_v26 = vadd.f32 0.5, %v1650_v22  ;;  %v1651_v27 = vmul.f32 0.5, %v2292_v24  ;;  %2305 = vtanh.f32 %v1402_v23  ;;  %v1403_v28 = vmul.f32 0.5, %v1136_v25 }
 0x292   : > { %v2294_v29 = vpop.eup %2293  ;;  %v1138_v30 = vpop.f32.mrf.mxu1 }
 0x293   : > { %1906 = vst [vmem:[%s3059_s9 + $0x188] sm:$0xff] %v1778_v26  ;;  %v1779_v31 = vadd.f32 0.5, %v1651_v27  ;;  %v1652_v32 = vmul.f32 0.5, %v2294_v29  ;;  %2307 = vtanh.f32 %v1403_v28  ;;  %v1404_v33 = vmul.f32 0.5, %v1138_v30 }
 0x294   : > { %v2296_v34 = vpop.eup %2295  ;;  %v1142_v35 = vpop.f32.mrf.mxu1 }
 0x295   : > { %1907 = vst [vmem:[%s3059_s9 + $0x190] sm:$0xff] %v1779_v31  ;;  %v1780_v36 = vadd.f32 0.5, %v1652_v32  ;;  %v1653_v38 = vmul.f32 0.5, %v2296_v34  ;;  %2309 = vtanh.f32 %v1404_v33  ;;  %v1405_v39 = vmul.f32 0.5, %v1142_v35 }
 0x296   : > { %v2298_v40 = vpop.eup %2297  ;;  %v1144_v41 = vpop.f32.mrf.mxu1 }
 0x297   : > { %1908 = vst [vmem:[%s3059_s9 + $0x198] sm:$0xff] %v1780_v36  ;;  %v1781_v42 = vadd.f32 0.5, %v1653_v38  ;;  %v1654_v43 = vmul.f32 0.5, %v2298_v40  ;;  %2311 = vtanh.f32 %v1405_v39  ;;  %v1406_v44 = vmul.f32 0.5, %v1144_v41 }
 0x298   : > { %v2300_v45 = vpop.eup %2299  ;;  %v1148_v46 = vpop.f32.mrf.mxu1 }
 0x299   : > { %1909 = vst [vmem:[%s3059_s9 + $0x1a0] sm:$0xff] %v1781_v42  ;;  %v1782_v47 = vadd.f32 0.5, %v1654_v43  ;;  %v1655_v48 = vmul.f32 0.5, %v2300_v45  ;;  %2313 = vtanh.f32 %v1406_v44  ;;  %v1407_v49 = vmul.f32 0.5, %v1148_v46 }
 0x29a   : > { %v2302_v50 = vpop.eup %2301  ;;  %v1150_v51 = vpop.f32.mrf.mxu1 }
 0x29b   : > { %1910 = vst [vmem:[%s3059_s9 + $0x1a8] sm:$0xff] %v1782_v47  ;;  %v1783_v52 = vadd.f32 0.5, %v1655_v48  ;;  %v1656_v53 = vmul.f32 0.5, %v2302_v50  ;;  %2315 = vtanh.f32 %v1407_v49  ;;  %v1408_v54 = vmul.f32 0.5, %v1150_v51 }
 0x29c   : > { %v2304_v55 = vpop.eup %2303  ;;  %v1154_v56 = vpop.f32.mrf.mxu1 }
 0x29d   : > { %1911 = vst [vmem:[%s3059_s9 + $0x1b0] sm:$0xff] %v1783_v52  ;;  %v1784_v57 = vadd.f32 0.5, %v1656_v53  ;;  %v1657_v58 = vmul.f32 0.5, %v2304_v55  ;;  %2317 = vtanh.f32 %v1408_v54  ;;  %v1409_v59 = vmul.f32 0.5, %v1154_v56 }
 0x29e   : > { %v2306_v60 = vpop.eup %2305  ;;  %v1156_v61 = vpop.f32.mrf.mxu1 }
 0x29f   : > { %1912 = vst [vmem:[%s3059_s9 + $0x1b8] sm:$0xff] %v1784_v57  ;;  %v1785_v62 = vadd.f32 0.5, %v1657_v58  ;;  %v1658_v63 = vmul.f32 0.5, %v2306_v60  ;;  %2319 = vtanh.f32 %v1409_v59  ;;  %v1410_v1 = vmul.f32 0.5, %v1156_v61 }
 0x2a0   : > { %v2308_v2 = vpop.eup %2307  ;;  %v1160_v3 = vpop.f32.mrf.mxu1 }
 0x2a1   : > { %1913 = vst [vmem:[%s3059_s9 + $0x1c0] sm:$0xff] %v1785_v62  ;;  %v1786_v4 = vadd.f32 0.5, %v1658_v63  ;;  %v1659_v5 = vmul.f32 0.5, %v2308_v2  ;;  %2321 = vtanh.f32 %v1410_v1  ;;  %v1411_v37 = vmul.f32 0.5, %v1160_v3 }
 0x2a2   : > { %v2310_v6 = vpop.eup %2309  ;;  %v1162_v8 = vpop.f32.mrf.mxu1 }
 0x2a3   : > { %1914 = vst [vmem:[%s3059_s9 + $0x1c8] sm:$0xff] %v1786_v4  ;;  %v1787_v9 = vadd.f32 0.5, %v1659_v5  ;;  %v1660_v10 = vmul.f32 0.5, %v2310_v6  ;;  %2323 = vtanh.f32 %v1411_v37  ;;  %v1412_v11 = vmul.f32 0.5, %v1162_v8 }
 0x2a4   : > { %v2312_v12 = vpop.eup %2311  ;;  %v1166_v7 = vpop.f32.mrf.mxu1 }
 0x2a5   : > { %1915 = vst [vmem:[%s3059_s9 + $0x1d0] sm:$0xff] %v1787_v9  ;;  %v1788_v13 = vadd.f32 0.5, %v1660_v10  ;;  %v1661_v14 = vmul.f32 0.5, %v2312_v12  ;;  %2325 = vtanh.f32 %v1412_v11  ;;  %v1413_v15 = vmul.f32 0.5, %v1166_v7 }
 0x2a6   : > { %v2314_v16 = vpop.eup %2313  ;;  %v1168_v17 = vpop.f32.mrf.mxu1 }
 0x2a7   : > { %1916 = vst [vmem:[%s3059_s9 + $0x1d8] sm:$0xff] %v1788_v13  ;;  %v1789_v18 = vadd.f32 0.5, %v1661_v14  ;;  %v1662_v0 = vmul.f32 0.5, %v2314_v16  ;;  %2327 = vtanh.f32 %v1413_v15  ;;  %v1414_v19 = vmul.f32 0.5, %v1168_v17 }
 0x2a8   : > { %v2316_v20 = vpop.eup %2315  ;;  %v1172_v21 = vpop.f32.mrf.mxu1 }
 0x2a9   : > { %1917 = vst [vmem:[%s3059_s9 + $0x1e0] sm:$0xff] %v1789_v18  ;;  %v1790_v22 = vadd.f32 0.5, %v1662_v0  ;;  %v1663_v23 = vmul.f32 0.5, %v2316_v20  ;;  %2329 = vtanh.f32 %v1414_v19  ;;  %v1415_v24 = vmul.f32 0.5, %v1172_v21 }
 0x2aa   : > { %v2318_v25 = vpop.eup %2317  ;;  %v1174_v26 = vpop.f32.mrf.mxu1 }
 0x2ab   : > { %1918 = vst [vmem:[%s3059_s9 + $0x1e8] sm:$0xff] %v1790_v22  ;;  %v1791_v27 = vadd.f32 0.5, %v1663_v23  ;;  %v1664_v28 = vmul.f32 0.5, %v2318_v25  ;;  %2331 = vtanh.f32 %v1415_v24  ;;  %v1416_v29 = vmul.f32 0.5, %v1174_v26 }
 0x2ac   : > { %v2320_v30 = vpop.eup %2319  ;;  %v1178_v31 = vpop.f32.mrf.mxu1 }
 0x2ad   : > { %1919 = vst [vmem:[%s3059_s9 + $0x1f0] sm:$0xff] %v1791_v27  ;;  %v1792_v32 = vadd.f32 0.5, %v1664_v28  ;;  %v1665_v33 = vmul.f32 0.5, %v2320_v30  ;;  %2333 = vtanh.f32 %v1416_v29  ;;  %v1417_v34 = vmul.f32 0.5, %v1178_v31 }
 0x2ae   : > { %v2322_v35 = vpop.eup %2321  ;;  %v1180_v36 = vpop.f32.mrf.mxu1 }
 0x2af   : > { %1920 = vst [vmem:[%s3059_s9 + $0x1f8] sm:$0xff] %v1792_v32  ;;  %v1793_v38 = vadd.f32 0.5, %v1665_v33  ;;  %v1666_v39 = vmul.f32 0.5, %v2322_v35  ;;  %2335 = vtanh.f32 %v1417_v34  ;;  %v1418_v40 = vmul.f32 0.5, %v1180_v36 }
 0x2b0   : > { %v2324_v41 = vpop.eup %2323  ;;  %v1184_v42 = vpop.f32.mrf.mxu1 }
 0x2b1   : > { %1921 = vst [vmem:[%s3059_s9 + $0x200] sm:$0xff] %v1793_v38  ;;  %v1794_v43 = vadd.f32 0.5, %v1666_v39  ;;  %v1667_v44 = vmul.f32 0.5, %v2324_v41  ;;  %2337 = vtanh.f32 %v1418_v40  ;;  %v1419_v45 = vmul.f32 0.5, %v1184_v42 }
 0x2b2   : > { %v2326_v46 = vpop.eup %2325  ;;  %v1186_v47 = vpop.f32.mrf.mxu1 }
 0x2b3   : > { %1922 = vst [vmem:[%s3059_s9 + $0x208] sm:$0xff] %v1794_v43  ;;  %v1795_v48 = vadd.f32 0.5, %v1667_v44  ;;  %v1668_v49 = vmul.f32 0.5, %v2326_v46  ;;  %2339 = vtanh.f32 %v1419_v45  ;;  %v1420_v50 = vmul.f32 0.5, %v1186_v47 }
 0x2b4   : > { %v2328_v51 = vpop.eup %2327  ;;  %v1190_v52 = vpop.f32.mrf.mxu1 }
 0x2b5   : > { %1923 = vst [vmem:[%s3059_s9 + $0x210] sm:$0xff] %v1795_v48  ;;  %v1796_v53 = vadd.f32 0.5, %v1668_v49  ;;  %v1669_v54 = vmul.f32 0.5, %v2328_v51  ;;  %2341 = vtanh.f32 %v1420_v50  ;;  %v1421_v55 = vmul.f32 0.5, %v1190_v52 }
 0x2b6   : > { %v2330_v56 = vpop.eup %2329  ;;  %v1192_v57 = vpop.f32.mrf.mxu1 }
 0x2b7   : > { %1924 = vst [vmem:[%s3059_s9 + $0x218] sm:$0xff] %v1796_v53  ;;  %v1797_v58 = vadd.f32 0.5, %v1669_v54  ;;  %v1670_v59 = vmul.f32 0.5, %v2330_v56  ;;  %2343 = vtanh.f32 %v1421_v55  ;;  %v1422_v60 = vmul.f32 0.5, %v1192_v57 }
 0x2b8   : > { %v2332_v61 = vpop.eup %2331  ;;  %v1196_v62 = vpop.f32.mrf.mxu1 }
 0x2b9   : > { %1925 = vst [vmem:[%s3059_s9 + $0x220] sm:$0xff] %v1797_v58  ;;  %v1798_v63 = vadd.f32 0.5, %v1670_v59  ;;  %v1671_v1 = vmul.f32 0.5, %v2332_v61  ;;  %2345 = vtanh.f32 %v1422_v60  ;;  %v1423_v2 = vmul.f32 0.5, %v1196_v62 }
 0x2ba   : > { %v2334_v3 = vpop.eup %2333  ;;  %v1198_v4 = vpop.f32.mrf.mxu1 }
 0x2bb   : > { %1926 = vst [vmem:[%s3059_s9 + $0x228] sm:$0xff] %v1798_v63  ;;  %v1799_v5 = vadd.f32 0.5, %v1671_v1  ;;  %v1672_v37 = vmul.f32 0.5, %v2334_v3  ;;  %2347 = vtanh.f32 %v1423_v2  ;;  %v1424_v6 = vmul.f32 0.5, %v1198_v4 }
 0x2bc   : > { %v2336_v8 = vpop.eup %2335  ;;  %v1202_v9 = vpop.f32.mrf.mxu1 }
 0x2bd   : > { %1927 = vst [vmem:[%s3059_s9 + $0x230] sm:$0xff] %v1799_v5  ;;  %v1800_v10 = vadd.f32 0.5, %v1672_v37  ;;  %v1673_v11 = vmul.f32 0.5, %v2336_v8  ;;  %2349 = vtanh.f32 %v1424_v6  ;;  %v1425_v12 = vmul.f32 0.5, %v1202_v9 }
 0x2be   : > { %v2338_v7 = vpop.eup %2337  ;;  %v1204_v13 = vpop.f32.mrf.mxu1 }
 0x2bf   : > { %1928 = vst [vmem:[%s3059_s9 + $0x238] sm:$0xff] %v1800_v10  ;;  %v1801_v14 = vadd.f32 0.5, %v1673_v11  ;;  %v1674_v15 = vmul.f32 0.5, %v2338_v7  ;;  %2351 = vtanh.f32 %v1425_v12  ;;  %v1426_v16 = vmul.f32 0.5, %v1204_v13 }
 0x2c0   : > { %v2340_v17 = vpop.eup %2339  ;;  %v1208_v18 = vpop.f32.mrf.mxu1 }
 0x2c1   : > { %1929 = vst [vmem:[%s3059_s9 + $0x240] sm:$0xff] %v1801_v14  ;;  %v1802_v0 = vadd.f32 0.5, %v1674_v15  ;;  %v1675_v19 = vmul.f32 0.5, %v2340_v17  ;;  %2353 = vtanh.f32 %v1426_v16  ;;  %v1427_v20 = vmul.f32 0.5, %v1208_v18 }
 0x2c2   : > { %v2342_v21 = vpop.eup %2341  ;;  %v1210_v22 = vpop.f32.mrf.mxu1 }
 0x2c3   : > { %1930 = vst [vmem:[%s3059_s9 + $0x248] sm:$0xff] %v1802_v0  ;;  %v1803_v23 = vadd.f32 0.5, %v1675_v19  ;;  %v1676_v24 = vmul.f32 0.5, %v2342_v21  ;;  %2355 = vtanh.f32 %v1427_v20  ;;  %v1428_v25 = vmul.f32 0.5, %v1210_v22 }
 0x2c4   : > { %v2344_v26 = vpop.eup %2343  ;;  %v1214_v27 = vpop.f32.mrf.mxu1 }
 0x2c5   : > { %1931 = vst [vmem:[%s3059_s9 + $0x250] sm:$0xff] %v1803_v23  ;;  %v1804_v28 = vadd.f32 0.5, %v1676_v24  ;;  %v1677_v29 = vmul.f32 0.5, %v2344_v26  ;;  %2357 = vtanh.f32 %v1428_v25  ;;  %v1429_v30 = vmul.f32 0.5, %v1214_v27 }
 0x2c6   : > { %v2346_v31 = vpop.eup %2345  ;;  %v1216_v32 = vpop.f32.mrf.mxu1 }
 0x2c7   : > { %1932 = vst [vmem:[%s3059_s9 + $0x258] sm:$0xff] %v1804_v28  ;;  %v1805_v33 = vadd.f32 0.5, %v1677_v29  ;;  %v1678_v34 = vmul.f32 0.5, %v2346_v31  ;;  %2359 = vtanh.f32 %v1429_v30  ;;  %v1430_v35 = vmul.f32 0.5, %v1216_v32 }
 0x2c8   : > { %v2348_v36 = vpop.eup %2347  ;;  %v1220_v38 = vpop.f32.mrf.mxu1 }
 0x2c9   : > { %1933 = vst [vmem:[%s3059_s9 + $0x260] sm:$0xff] %v1805_v33  ;;  %v1806_v39 = vadd.f32 0.5, %v1678_v34  ;;  %v1679_v40 = vmul.f32 0.5, %v2348_v36  ;;  %2361 = vtanh.f32 %v1430_v35  ;;  %v1431_v41 = vmul.f32 0.5, %v1220_v38 }
 0x2ca   : > { %v2350_v42 = vpop.eup %2349  ;;  %v1222_v43 = vpop.f32.mrf.mxu1 }
 0x2cb   : > { %1934 = vst [vmem:[%s3059_s9 + $0x268] sm:$0xff] %v1806_v39  ;;  %v1807_v44 = vadd.f32 0.5, %v1679_v40  ;;  %v1680_v45 = vmul.f32 0.5, %v2350_v42  ;;  %2363 = vtanh.f32 %v1431_v41  ;;  %v1432_v46 = vmul.f32 0.5, %v1222_v43 }
 0x2cc   : > { %v2352_v47 = vpop.eup %2351  ;;  %v1226_v48 = vpop.f32.mrf.mxu1 }
 0x2cd   : > { %1935 = vst [vmem:[%s3059_s9 + $0x270] sm:$0xff] %v1807_v44  ;;  %v1808_v49 = vadd.f32 0.5, %v1680_v45  ;;  %v1681_v50 = vmul.f32 0.5, %v2352_v47  ;;  %2365 = vtanh.f32 %v1432_v46  ;;  %v1433_v51 = vmul.f32 0.5, %v1226_v48 }
 0x2ce   : > { %v2354_v52 = vpop.eup %2353  ;;  %v1228_v53 = vpop.f32.mrf.mxu1 }
 0x2cf   : > { %1936 = vst [vmem:[%s3059_s9 + $0x278] sm:$0xff] %v1808_v49  ;;  %v1809_v54 = vadd.f32 0.5, %v1681_v50  ;;  %v1682_v55 = vmul.f32 0.5, %v2354_v52  ;;  %2367 = vtanh.f32 %v1433_v51  ;;  %v1434_v56 = vmul.f32 0.5, %v1228_v53 }
 0x2d0   : > { %v2356_v57 = vpop.eup %2355  ;;  %v1232_v58 = vpop.f32.mrf.mxu1 }
 0x2d1   : > { %1937 = vst [vmem:[%s3059_s9 + $0x280] sm:$0xff] %v1809_v54  ;;  %v1810_v59 = vadd.f32 0.5, %v1682_v55  ;;  %v1683_v60 = vmul.f32 0.5, %v2356_v57  ;;  %2369 = vtanh.f32 %v1434_v56  ;;  %v1435_v61 = vmul.f32 0.5, %v1232_v58 }
 0x2d2   : > { %v2358_v62 = vpop.eup %2357  ;;  %v1234_v63 = vpop.f32.mrf.mxu1 }
 0x2d3   : > { %1938 = vst [vmem:[%s3059_s9 + $0x288] sm:$0xff] %v1810_v59  ;;  %v1811_v1 = vadd.f32 0.5, %v1683_v60  ;;  %v1684_v2 = vmul.f32 0.5, %v2358_v62  ;;  %2371 = vtanh.f32 %v1435_v61  ;;  %v1436_v3 = vmul.f32 0.5, %v1234_v63 }
 0x2d4   : > { %v2360_v4 = vpop.eup %2359  ;;  %v1238_v5 = vpop.f32.mrf.mxu1 }
 0x2d5   : > { %1939 = vst [vmem:[%s3059_s9 + $0x290] sm:$0xff] %v1811_v1  ;;  %v1812_v37 = vadd.f32 0.5, %v1684_v2  ;;  %v1685_v6 = vmul.f32 0.5, %v2360_v4  ;;  %2373 = vtanh.f32 %v1436_v3  ;;  %v1437_v8 = vmul.f32 0.5, %v1238_v5 }
 0x2d6   : > { %v2362_v9 = vpop.eup %2361  ;;  %v1240_v10 = vpop.f32.mrf.mxu1 }
 0x2d7   : > { %1940 = vst [vmem:[%s3059_s9 + $0x298] sm:$0xff] %v1812_v37  ;;  %v1813_v11 = vadd.f32 0.5, %v1685_v6  ;;  %v1686_v12 = vmul.f32 0.5, %v2362_v9  ;;  %2375 = vtanh.f32 %v1437_v8  ;;  %v1438_v7 = vmul.f32 0.5, %v1240_v10 }
 0x2d8   : > { %v2364_v13 = vpop.eup %2363  ;;  %v1244_v14 = vpop.f32.mrf.mxu1 }
 0x2d9   : > { %1941 = vst [vmem:[%s3059_s9 + $0x2a0] sm:$0xff] %v1813_v11  ;;  %v1814_v15 = vadd.f32 0.5, %v1686_v12  ;;  %v1687_v16 = vmul.f32 0.5, %v2364_v13  ;;  %2377 = vtanh.f32 %v1438_v7  ;;  %v1439_v17 = vmul.f32 0.5, %v1244_v14 }
 0x2da   : > { %v2366_v18 = vpop.eup %2365  ;;  %v1246_v0 = vpop.f32.mrf.mxu1 }
 0x2db   : > { %1942 = vst [vmem:[%s3059_s9 + $0x2a8] sm:$0xff] %v1814_v15  ;;  %v1815_v19 = vadd.f32 0.5, %v1687_v16  ;;  %v1688_v20 = vmul.f32 0.5, %v2366_v18  ;;  %2379 = vtanh.f32 %v1439_v17  ;;  %v1440_v21 = vmul.f32 0.5, %v1246_v0 }
 0x2dc   : > { %v2368_v22 = vpop.eup %2367  ;;  %v1250_v23 = vpop.f32.mrf.mxu1 }
 0x2dd   : > { %1943 = vst [vmem:[%s3059_s9 + $0x2b0] sm:$0xff] %v1815_v19  ;;  %v1816_v24 = vadd.f32 0.5, %v1688_v20  ;;  %v1689_v25 = vmul.f32 0.5, %v2368_v22  ;;  %2381 = vtanh.f32 %v1440_v21  ;;  %v1441_v26 = vmul.f32 0.5, %v1250_v23 }
 0x2de   : > { %v2370_v27 = vpop.eup %2369  ;;  %v1252_v28 = vpop.f32.mrf.mxu1 }
 0x2df   : > { %1944 = vst [vmem:[%s3059_s9 + $0x2b8] sm:$0xff] %v1816_v24  ;;  %v1817_v29 = vadd.f32 0.5, %v1689_v25  ;;  %v1690_v30 = vmul.f32 0.5, %v2370_v27  ;;  %2383 = vtanh.f32 %v1441_v26  ;;  %v1442_v31 = vmul.f32 0.5, %v1252_v28 }
 0x2e0   : > { %v2372_v32 = vpop.eup %2371  ;;  %v1256_v33 = vpop.f32.mrf.mxu1 }
 0x2e1   : > { %1945 = vst [vmem:[%s3059_s9 + $0x2c0] sm:$0xff] %v1817_v29  ;;  %v1818_v34 = vadd.f32 0.5, %v1690_v30  ;;  %v1691_v35 = vmul.f32 0.5, %v2372_v32  ;;  %2385 = vtanh.f32 %v1442_v31  ;;  %v1443_v36 = vmul.f32 0.5, %v1256_v33 }
 0x2e2   : > { %v2374_v38 = vpop.eup %2373  ;;  %v1258_v39 = vpop.f32.mrf.mxu1 }
 0x2e3   : > { %1946 = vst [vmem:[%s3059_s9 + $0x2c8] sm:$0xff] %v1818_v34  ;;  %v1819_v40 = vadd.f32 0.5, %v1691_v35  ;;  %v1692_v41 = vmul.f32 0.5, %v2374_v38  ;;  %2387 = vtanh.f32 %v1443_v36  ;;  %v1444_v42 = vmul.f32 0.5, %v1258_v39 }
 0x2e4   : > { %v2376_v43 = vpop.eup %2375  ;;  %v1262_v44 = vpop.f32.mrf.mxu1 }
 0x2e5   : > { %1947 = vst [vmem:[%s3059_s9 + $0x2d0] sm:$0xff] %v1819_v40  ;;  %v1820_v45 = vadd.f32 0.5, %v1692_v41  ;;  %v1693_v46 = vmul.f32 0.5, %v2376_v43  ;;  %2389 = vtanh.f32 %v1444_v42  ;;  %v1445_v47 = vmul.f32 0.5, %v1262_v44 }
 0x2e6   : > { %v2378_v48 = vpop.eup %2377  ;;  %v1264_v49 = vpop.f32.mrf.mxu1 }
 0x2e7   : > { %1948 = vst [vmem:[%s3059_s9 + $0x2d8] sm:$0xff] %v1820_v45  ;;  %v1821_v50 = vadd.f32 0.5, %v1693_v46  ;;  %v1694_v51 = vmul.f32 0.5, %v2378_v48  ;;  %2391 = vtanh.f32 %v1445_v47  ;;  %v1446_v52 = vmul.f32 0.5, %v1264_v49 }
 0x2e8   : > { %v2380_v53 = vpop.eup %2379  ;;  %v1268_v54 = vpop.f32.mrf.mxu1 }
 0x2e9   : > { %1949 = vst [vmem:[%s3059_s9 + $0x2e0] sm:$0xff] %v1821_v50  ;;  %v1822_v55 = vadd.f32 0.5, %v1694_v51  ;;  %v1695_v56 = vmul.f32 0.5, %v2380_v53  ;;  %2393 = vtanh.f32 %v1446_v52  ;;  %v1447_v57 = vmul.f32 0.5, %v1268_v54 }
 0x2ea   : > { %v2382_v58 = vpop.eup %2381  ;;  %v1270_v59 = vpop.f32.mrf.mxu1 }
 0x2eb   : > { %1950 = vst [vmem:[%s3059_s9 + $0x2e8] sm:$0xff] %v1822_v55  ;;  %v1823_v60 = vadd.f32 0.5, %v1695_v56  ;;  %v1696_v61 = vmul.f32 0.5, %v2382_v58  ;;  %2395 = vtanh.f32 %v1447_v57  ;;  %v1448_v62 = vmul.f32 0.5, %v1270_v59 }
 0x2ec   : > { %v2384_v63 = vpop.eup %2383  ;;  %v1274_v1 = vpop.f32.mrf.mxu1 }
 0x2ed   : > { %1951 = vst [vmem:[%s3059_s9 + $0x2f0] sm:$0xff] %v1823_v60  ;;  %v1824_v2 = vadd.f32 0.5, %v1696_v61  ;;  %v1697_v3 = vmul.f32 0.5, %v2384_v63  ;;  %2397 = vtanh.f32 %v1448_v62  ;;  %v1449_v4 = vmul.f32 0.5, %v1274_v1 }
 0x2ee   : > { %v2386_v5 = vpop.eup %2385  ;;  %v1276_v37 = vpop.f32.mrf.mxu1 }
 0x2ef   : > { %1952 = vst [vmem:[%s3059_s9 + $0x2f8] sm:$0xff] %v1824_v2  ;;  %v1825_v6 = vadd.f32 0.5, %v1697_v3  ;;  %v1698_v8 = vmul.f32 0.5, %v2386_v5  ;;  %2399 = vtanh.f32 %v1449_v4  ;;  %v1450_v9 = vmul.f32 0.5, %v1276_v37 }
 0x2f0   : > { %v2388_v10 = vpop.eup %2387  ;;  %v1280_v11 = vpop.f32.mrf.mxu1 }
 0x2f1   : > { %1953 = vst [vmem:[%s3059_s9 + $0x300] sm:$0xff] %v1825_v6  ;;  %v1826_v12 = vadd.f32 0.5, %v1698_v8  ;;  %v1699_v7 = vmul.f32 0.5, %v2388_v10  ;;  %2401 = vtanh.f32 %v1450_v9  ;;  %v1451_v13 = vmul.f32 0.5, %v1280_v11 }
 0x2f2   : > { %v2390_v14 = vpop.eup %2389  ;;  %v1282_v15 = vpop.f32.mrf.mxu1 }
 0x2f3   : > { %1954 = vst [vmem:[%s3059_s9 + $0x308] sm:$0xff] %v1826_v12  ;;  %v1827_v16 = vadd.f32 0.5, %v1699_v7  ;;  %v1700_v17 = vmul.f32 0.5, %v2390_v14  ;;  %2403 = vtanh.f32 %v1451_v13  ;;  %v1452_v18 = vmul.f32 0.5, %v1282_v15 }
 0x2f4   : > { %v2392_v0 = vpop.eup %2391  ;;  %v1286_v19 = vpop.f32.mrf.mxu1 }
 0x2f5   : > { %1955 = vst [vmem:[%s3059_s9 + $0x310] sm:$0xff] %v1827_v16  ;;  %v1828_v20 = vadd.f32 0.5, %v1700_v17  ;;  %v1701_v21 = vmul.f32 0.5, %v2392_v0  ;;  %2405 = vtanh.f32 %v1452_v18  ;;  %v1453_v22 = vmul.f32 0.5, %v1286_v19 }
 0x2f6   : > { %v2394_v23 = vpop.eup %2393  ;;  %v1288_v24 = vpop.f32.mrf.mxu1 }
 0x2f7   : > { %1956 = vst [vmem:[%s3059_s9 + $0x318] sm:$0xff] %v1828_v20  ;;  %v1829_v25 = vadd.f32 0.5, %v1701_v21  ;;  %v1702_v26 = vmul.f32 0.5, %v2394_v23  ;;  %2407 = vtanh.f32 %v1453_v22  ;;  %v1454_v27 = vmul.f32 0.5, %v1288_v24 }
 0x2f8   : > { %v2396_v28 = vpop.eup %2395  ;;  %v1292_v29 = vpop.f32.mrf.mxu1 }
 0x2f9   : > { %1957 = vst [vmem:[%s3059_s9 + $0x320] sm:$0xff] %v1829_v25  ;;  %v1830_v30 = vadd.f32 0.5, %v1702_v26  ;;  %v1703_v31 = vmul.f32 0.5, %v2396_v28  ;;  %2409 = vtanh.f32 %v1454_v27  ;;  %v1455_v32 = vmul.f32 0.5, %v1292_v29 }
 0x2fa   : > { %v2398_v33 = vpop.eup %2397  ;;  %v1294_v34 = vpop.f32.mrf.mxu1 }
 0x2fb   : > { %1958 = vst [vmem:[%s3059_s9 + $0x328] sm:$0xff] %v1830_v30  ;;  %v1831_v35 = vadd.f32 0.5, %v1703_v31  ;;  %v1704_v36 = vmul.f32 0.5, %v2398_v33  ;;  %2411 = vtanh.f32 %v1455_v32  ;;  %v1456_v38 = vmul.f32 0.5, %v1294_v34 }
 0x2fc   : > { %v2400_v39 = vpop.eup %2399  ;;  %v1298_v40 = vpop.f32.mrf.mxu1 }
 0x2fd   : > { %1959 = vst [vmem:[%s3059_s9 + $0x330] sm:$0xff] %v1831_v35  ;;  %v1832_v41 = vadd.f32 0.5, %v1704_v36  ;;  %v1705_v42 = vmul.f32 0.5, %v2400_v39  ;;  %2413 = vtanh.f32 %v1456_v38  ;;  %v1457_v43 = vmul.f32 0.5, %v1298_v40 }
 0x2fe   : > { %v2402_v44 = vpop.eup %2401  ;;  %v1300_v45 = vpop.f32.mrf.mxu1 }
 0x2ff   : > { %1960 = vst [vmem:[%s3059_s9 + $0x338] sm:$0xff] %v1832_v41  ;;  %v1833_v46 = vadd.f32 0.5, %v1705_v42  ;;  %v1706_v47 = vmul.f32 0.5, %v2402_v44  ;;  %2415 = vtanh.f32 %v1457_v43  ;;  %v1458_v48 = vmul.f32 0.5, %v1300_v45 }
 0x300   : > { %v2404_v49 = vpop.eup %2403  ;;  %v1304_v50 = vpop.f32.mrf.mxu1 }
 0x301   : > { %1961 = vst [vmem:[%s3059_s9 + $0x340] sm:$0xff] %v1833_v46  ;;  %v1834_v51 = vadd.f32 0.5, %v1706_v47  ;;  %v1707_v52 = vmul.f32 0.5, %v2404_v49  ;;  %2417 = vtanh.f32 %v1458_v48  ;;  %v1459_v53 = vmul.f32 0.5, %v1304_v50 }
 0x302   : > { %v2406_v54 = vpop.eup %2405  ;;  %v1306_v55 = vpop.f32.mrf.mxu1 }
 0x303   : > { %1962 = vst [vmem:[%s3059_s9 + $0x348] sm:$0xff] %v1834_v51  ;;  %v1835_v56 = vadd.f32 0.5, %v1707_v52  ;;  %v1708_v57 = vmul.f32 0.5, %v2406_v54  ;;  %2419 = vtanh.f32 %v1459_v53  ;;  %v1460_v58 = vmul.f32 0.5, %v1306_v55 }
 0x304   : > { %v2408_v59 = vpop.eup %2407  ;;  %v1310_v60 = vpop.f32.mrf.mxu1 }
 0x305   : > { %1963 = vst [vmem:[%s3059_s9 + $0x350] sm:$0xff] %v1835_v56  ;;  %v1836_v61 = vadd.f32 0.5, %v1708_v57  ;;  %v1709_v62 = vmul.f32 0.5, %v2408_v59  ;;  %2421 = vtanh.f32 %v1460_v58  ;;  %v1461_v63 = vmul.f32 0.5, %v1310_v60 }
 0x306   : > { %v2410_v1 = vpop.eup %2409  ;;  %v1312_v2 = vpop.f32.mrf.mxu1 }
 0x307   : > { %1964 = vst [vmem:[%s3059_s9 + $0x358] sm:$0xff] %v1836_v61  ;;  %v1837_v3 = vadd.f32 0.5, %v1709_v62  ;;  %v1710_v4 = vmul.f32 0.5, %v2410_v1  ;;  %2423 = vtanh.f32 %v1461_v63  ;;  %v1462_v5 = vmul.f32 0.5, %v1312_v2 }
 0x308   : > { %v2412_v37 = vpop.eup %2411  ;;  %v1316_v6 = vpop.f32.mrf.mxu1 }
 0x309   : > { %1965 = vst [vmem:[%s3059_s9 + $0x360] sm:$0xff] %v1837_v3  ;;  %v1838_v8 = vadd.f32 0.5, %v1710_v4  ;;  %v1711_v9 = vmul.f32 0.5, %v2412_v37  ;;  %2425 = vtanh.f32 %v1462_v5  ;;  %v1463_v10 = vmul.f32 0.5, %v1316_v6 }
 0x30a   : > { %v2414_v11 = vpop.eup %2413  ;;  %v1318_v12 = vpop.f32.mrf.mxu1 }
 0x30b   : > { %1966 = vst [vmem:[%s3059_s9 + $0x368] sm:$0xff] %v1838_v8  ;;  %v1839_v7 = vadd.f32 0.5, %v1711_v9  ;;  %v1712_v13 = vmul.f32 0.5, %v2414_v11  ;;  %2427 = vtanh.f32 %v1463_v10  ;;  %v1464_v14 = vmul.f32 0.5, %v1318_v12 }
 0x30c   : > { %v2416_v15 = vpop.eup %2415  ;;  %v1322_v16 = vpop.f32.mrf.mxu1 }
 0x30d   : > { %1967 = vst [vmem:[%s3059_s9 + $0x370] sm:$0xff] %v1839_v7  ;;  %v1840_v17 = vadd.f32 0.5, %v1712_v13  ;;  %v1713_v18 = vmul.f32 0.5, %v2416_v15  ;;  %2429 = vtanh.f32 %v1464_v14  ;;  %v1465_v0 = vmul.f32 0.5, %v1322_v16 }
 0x30e   : > { %v2418_v19 = vpop.eup %2417  ;;  %v1324_v20 = vpop.f32.mrf.mxu1 }
 0x30f   : > { %1968 = vst [vmem:[%s3059_s9 + $0x378] sm:$0xff] %v1840_v17  ;;  %v1841_v21 = vadd.f32 0.5, %v1713_v18  ;;  %v1714_v22 = vmul.f32 0.5, %v2418_v19  ;;  %2431 = vtanh.f32 %v1465_v0  ;;  %v1466_v23 = vmul.f32 0.5, %v1324_v20 }
 0x310   : > { %v2420_v24 = vpop.eup %2419  ;;  %v1328_v25 = vpop.f32.mrf.mxu1 }
 0x311   : > { %1969 = vst [vmem:[%s3059_s9 + $0x380] sm:$0xff] %v1841_v21  ;;  %v1842_v26 = vadd.f32 0.5, %v1714_v22  ;;  %v1715_v27 = vmul.f32 0.5, %v2420_v24  ;;  %2433 = vtanh.f32 %v1466_v23  ;;  %v1467_v28 = vmul.f32 0.5, %v1328_v25 }
 0x312   : > { %v2422_v29 = vpop.eup %2421  ;;  %v1330_v30 = vpop.f32.mrf.mxu1 }
 0x313   : > { %1970 = vst [vmem:[%s3059_s9 + $0x388] sm:$0xff] %v1842_v26  ;;  %v1843_v31 = vadd.f32 0.5, %v1715_v27  ;;  %v1716_v32 = vmul.f32 0.5, %v2422_v29  ;;  %2435 = vtanh.f32 %v1467_v28  ;;  %v1468_v33 = vmul.f32 0.5, %v1330_v30 }
 0x314   : > { %v2424_v34 = vpop.eup %2423  ;;  %v1334_v35 = vpop.f32.mrf.mxu1 }
 0x315   : > { %1971 = vst [vmem:[%s3059_s9 + $0x390] sm:$0xff] %v1843_v31  ;;  %v1844_v36 = vadd.f32 0.5, %v1716_v32  ;;  %v1717_v38 = vmul.f32 0.5, %v2424_v34  ;;  %2437 = vtanh.f32 %v1468_v33  ;;  %v1469_v39 = vmul.f32 0.5, %v1334_v35 }
 0x316   : > { %v2426_v40 = vpop.eup %2425  ;;  %v1336_v41 = vpop.f32.mrf.mxu1 }
 0x317   : > { %1972 = vst [vmem:[%s3059_s9 + $0x398] sm:$0xff] %v1844_v36  ;;  %v1845_v42 = vadd.f32 0.5, %v1717_v38  ;;  %v1718_v43 = vmul.f32 0.5, %v2426_v40  ;;  %2439 = vtanh.f32 %v1469_v39  ;;  %v1470_v44 = vmul.f32 0.5, %v1336_v41 }
 0x318   : > { %v2428_v45 = vpop.eup %2427  ;;  %v1340_v46 = vpop.f32.mrf.mxu1 }
 0x319   : > { %1973 = vst [vmem:[%s3059_s9 + $0x3a0] sm:$0xff] %v1845_v42  ;;  %v1846_v47 = vadd.f32 0.5, %v1718_v43  ;;  %v1719_v48 = vmul.f32 0.5, %v2428_v45  ;;  %2441 = vtanh.f32 %v1470_v44  ;;  %v1471_v49 = vmul.f32 0.5, %v1340_v46 }
 0x31a   : > { %v2430_v50 = vpop.eup %2429  ;;  %v1342_v51 = vpop.f32.mrf.mxu1 }
 0x31b   : > { %1974 = vst [vmem:[%s3059_s9 + $0x3a8] sm:$0xff] %v1846_v47  ;;  %v1847_v52 = vadd.f32 0.5, %v1719_v48  ;;  %v1720_v53 = vmul.f32 0.5, %v2430_v50  ;;  %2443 = vtanh.f32 %v1471_v49  ;;  %v1472_v54 = vmul.f32 0.5, %v1342_v51 }
 0x31c   : > { %v2432_v55 = vpop.eup %2431 }
 0x31d   : > { %1975 = vst [vmem:[%s3059_s9 + $0x3b0] sm:$0xff] %v1847_v52  ;;  %v1848_v56 = vadd.f32 0.5, %v1720_v53  ;;  %v1721_v57 = vmul.f32 0.5, %v2432_v55  ;;  %2445 = vtanh.f32 %v1472_v54 }
 0x31e   : > { %v2434_v58 = vpop.eup %2433 }
 0x31f   : > { %1976 = vst [vmem:[%s3059_s9 + $0x3b8] sm:$0xff] %v1848_v56  ;;  %v1849_v59 = vadd.f32 0.5, %v1721_v57  ;;  %v1722_v60 = vmul.f32 0.5, %v2434_v58 }
 0x320   : > { %v2436_v61 = vpop.eup %2435 }
 0x321   : > { %1977 = vst [vmem:[%s3059_s9 + $0x3c0] sm:$0xff] %v1849_v59  ;;  %v1850_v62 = vadd.f32 0.5, %v1722_v60  ;;  %v1723_v63 = vmul.f32 0.5, %v2436_v61 }
 0x322   : > { %v2438_v1 = vpop.eup %2437 }
 0x323   : > { %1978 = vst [vmem:[%s3059_s9 + $0x3c8] sm:$0xff] %v1850_v62  ;;  %v1851_v2 = vadd.f32 0.5, %v1723_v63  ;;  %v1724_v3 = vmul.f32 0.5, %v2438_v1 }
 0x324   : > { %v2440_v4 = vpop.eup %2439 }
 0x325   : > { %1979 = vst [vmem:[%s3059_s9 + $0x3d0] sm:$0xff] %v1851_v2  ;;  %v1852_v5 = vadd.f32 0.5, %v1724_v3  ;;  %v1725_v37 = vmul.f32 0.5, %v2440_v4 }
 0x326   : > { %v2442_v6 = vpop.eup %2441 }
 0x327   : > { %1980 = vst [vmem:[%s3059_s9 + $0x3d8] sm:$0xff] %v1852_v5  ;;  %v1853_v8 = vadd.f32 0.5, %v1725_v37  ;;  %v1726_v9 = vmul.f32 0.5, %v2442_v6 }
 0x328   : > { %v2444_v10 = vpop.eup %2443 }
 0x329   : > { %1981 = vst [vmem:[%s3059_s9 + $0x3e0] sm:$0xff] %v1853_v8  ;;  %v1854_v11 = vadd.f32 0.5, %v1726_v9  ;;  %v1727_v12 = vmul.f32 0.5, %v2444_v10 }
 0x32a   : > { %v2446_v7 = vpop.eup %2445 }
 0x32b   : > { %1982 = vst [vmem:[%s3059_s9 + $0x3e8] sm:$0xff] %v1854_v11  ;;  %v1855_v13 = vadd.f32 0.5, %v1727_v12  ;;  %v1728_v14 = vmul.f32 0.5, %v2446_v7 }
 0x32d   : > { %1983 = vst [vmem:[%s3059_s9 + $0x3f0] sm:$0xff] %v1855_v13  ;;  %v1856_v15 = vadd.f32 0.5, %v1728_v14 }
 0x32f   : > { %1984 = vst [vmem:[%s3059_s9 + $0x3f8] sm:$0xff] %v1856_v15 }
 0x330   : > { %2541 = shalt.err (!%p2538_p9)
}
 0x331   : > { %s2542_s27 = scalar_lea.hbm %s3216_s26, 16384  ;;  %s2546_s23 = scalar_lea.hbm %s3267_s4, 32768 }
 0x332   : > { %p2543_p13 = scmp.ne.s32.totalorder %s3216_s26, %s2542_s27  ;;  %p2547_p4 = scmp.lt.s32.totalorder %s3216_s26, %s3267_s4 }
 0x333   : > { %p2548_p8 = scmp.lt.s32.totalorder %s2546_s23, %s2542_s27 }
 0x334   : > { %p2544_p5 = pnand %p2543_p13, %p3283_p10 }
 0x335   : > { %p2549_p7 = por %p2548_p8, %p2547_p4 }
 0x336   : > { %p2545_p0 = pneg %p2544_p5 }
 0x338   : > { %p2550_p11 = pnand %p2549_p7, %p2545_p0 }
 0x33a   : > { %2553 = shalt.err (!%p2550_p11)
}
 0x33b   : > { %s2607_s5 = smov 256   ;;  %s2608_s7 = smov 16  }
 0x33c   : > { %2127 = dma.vmem_to_hbm [thread:$0]  (%p3283_p10), %s3218_s11, 16384, %s3216_s26, %s1986_s30, %s2607_s5, %s2607_s5, %s2608_s7  }
 0x33d PF: > { %s2015_s28 = sand.u32 1, %s2584_s15   ;;  %p3284_p1 = scmp.ne.s32.totalorder %s3273_s22, 0 }
 0x33e   : > { %p3285_p2 = scmp.ge.s32.totalorder %s2596_s18, 2  ;;  %s2016_s29 = scalar_lea.sflag [#allocation4], %s2015_s28 }
 0x340   : > { %p2141_p6 = pnand %p3285_p2, %p3284_p1 }
 0x342   : > { %p2142_p12 = pneg %p2141_p6 }
 0x344   : > { %2579 = dma.done.wait (%p2142_p12), %s2016_s29, 16384  }
 0x345   : > { %2581 = vsyncadd (%p2142_p12), %s2016_s29, 4294950912  ;;  %p18_p3 = scmp.ge.s32.totalorder %s2709_s13, 4   ;;  %s3286_s15 = smov %s2588_s16 }
 0x346   : > { %s3287_s16 = smov %s2592_s17  ;;  %s3288_s17 = smov %s2718_s24 }
 0x347   : > { %s3289_s18 = smov %s2709_s13  ;;  %20 = sbr.rel (!%p18_p3) target bundleno = 6 (0x6), region = 89 }
 0x34c   :  { %2021 = vsyncpa [#allocation3], 1 }
 0x34d   :  { %2023 = vsyncpa [#allocation3 + $0x1], 1 }
 0x34e   :  { %2024 = vsyncpa [#allocation6], 1 }
 0x34f   :  { %2025 = vsyncpa [#allocation4], 1 }
 0x350   :  { %2027 = vsyncpa [#allocation4 + $0x1], 1 }

</bundles_post_ra>
